<compile_context>
chip_gen: v7x
topology: tpu7x:2x2x1
jax: 0.10.0
libtpu: 0.0.40
codegen_flags: <defaults>
</compile_context>

<pallas_src>
import jax
import jax.numpy as jnp
from jax.experimental import pallas as pl
from jax.experimental.pallas import tpu as pltpu


def _make_wa_kernel(H, W, Bblk, C, Cmid):
    HW = H * W
    # tap order = (kh, kw) row-major, i.e. t = kh*3 + kw with (dy, dx) = (kh-1, kw-1)
    TAPS = tuple((dy, dx) for dy in (-1, 0, 1) for dx in (-1, 0, 1))

    def kernel(l_ref, g_ref, w1_ref, w2_ref, ws1_ref, ws2_ref, wo_ref, b_ref,
               out_ref):
        # l_ref  : (Bblk, C, HW)   local features (channels-first, flat spatial)
        # g_ref  : (Bblk, C, HW)   global features (unpadded, lane-aligned)
        # w1_ref : (Cmid, C)       channel-attn 1x1 conv #1
        # w2_ref : (C, Cmid)       channel-attn 1x1 conv #2
        # ws1_ref: (9, Cmid, C)    spatial-attn 3x3 conv #1, tap-major
        # ws2_ref: (9, Cmid)       spatial-attn 3x3 conv #2, tap-major
        # wo_ref : (1, C)          output 1x1 conv weight
        # b_ref  : (1,)            output bias scalar (SMEM)
        # out_ref: (Bblk, 1, HW)   lane-dense output slab
        l = l_ref[...]
        g = g_ref[...]
        w1 = w1_ref[...]
        w2 = w2_ref[...]
        ws1 = ws1_ref[...]
        ws2 = ws2_ref[...]
        wo = wo_ref[...]

        # lane-position masks for taps shifted in W (kill row wrap-around)
        col = jax.lax.broadcasted_iota(jnp.int32, (1, 1, HW), 2) % W
        mask_left = col >= 1          # valid when reading column w-1
        mask_right = col < (W - 1)    # valid when reading column w+1

        def shifted(x, dy, dx):
            """y[..., p] = x[..., p + dy*W + dx] for in-image taps, else 0.

            Built from a static lane slice + zero fill (out-of-array reads) and
            the W-boundary mask (in-array row wrap) — no padded buffer.
            """
            d = dy * W + dx
            nc = x.shape[1]
            if d > 0:
                y = jnp.concatenate(
                    [x[:, :, d:], jnp.zeros((Bblk, nc, d), jnp.float32)], axis=-1)
            elif d < 0:
                y = jnp.concatenate(
                    [jnp.zeros((Bblk, nc, -d), jnp.float32), x[:, :, :d]], axis=-1)
            else:
                y = x
            if dx == -1:
                y = jnp.where(mask_left, y, 0.0)
            elif dx == 1:
                y = jnp.where(mask_right, y, 0.0)
            return y

        # ---- channel attention: GAP -> 1x1 -> ReLU -> 1x1 -> sigmoid (VPU/XLU)
        pooled = jnp.sum(g, axis=-1) * (1.0 / HW)                            # (Bblk, C)
        hca = jnp.maximum(
            jnp.sum(w1[None] * pooled[:, None, :], axis=-1), 0.0)            # (Bblk, Cmid)
        ca = jax.nn.sigmoid(
            jnp.sum(w2[None] * hca[:, None, :], axis=-1))                    # (Bblk, C)

        # ---- spatial attention conv #1: 3x3 C -> Cmid, per-tap VPU MAC
        cols = [jnp.zeros((Bblk, HW), jnp.float32) for _ in range(Cmid)]
        for t, (dy, dx) in enumerate(TAPS):
            win = shifted(g, dy, dx)                                         # (Bblk, C, HW)
            for m in range(Cmid):
                cols[m] = cols[m] + jnp.sum(
                    win * ws1[t, m][None, :, None], axis=1)                  # (Bblk, HW)
        hsa = jnp.maximum(jnp.stack(cols, axis=1), 0.0)                      # (Bblk, Cmid, HW)

        # ---- spatial attention conv #2: 3x3 Cmid -> 1, per-tap accumulate
        sa_logit = jnp.zeros((Bblk, HW), jnp.float32)
        for t, (dy, dx) in enumerate(TAPS):
            win = shifted(hsa, dy, dx)                                       # (Bblk, Cmid, HW)
            sa_logit = sa_logit + jnp.sum(win * ws2[t][None, :, None], axis=1)
        sa = jax.nn.sigmoid(sa_logit)                                        # (Bblk, HW)

        # ---- gating + fused output 1x1 conv: out = sa * sum_c(wo_c*ca_c*l_c) + b
        caw = ca * wo                                                        # (Bblk, C)
        gated = jnp.sum(caw[:, :, None] * l, axis=1)                         # (Bblk, HW)
        res = sa * gated + b_ref[0]                                          # (Bblk, HW)
        out_ref[...] = res[:, None, :].astype(out_ref.dtype)

    return kernel


def _pick_bblk(B):
    """Largest divisor of B giving a grid of length >= 2 (blocks capped at 8)."""
    if B <= 1:
        return 1
    cap = max(1, min(8, B // 2))
    for d in range(cap, 0, -1):
        if B % d == 0:
            return d
    return 1


def wight_attendtion_forward(local_feat, global_feat, params):
    """local_feat, global_feat: (B, C, H, W) NCHW float32. Returns (B, 1, H, W)."""
    B, C, H, W = local_feat.shape
    Cmid = C // 2
    HW = H * W

    Bblk = _pick_bblk(B)
    grid = (B // Bblk,)

    # channels-first, flattened spatial (H*W on the lane axis); NO padding.
    l_flat = local_feat.reshape(B, C, HW)
    g_flat = global_feat.reshape(B, C, HW)

    # repack PyTorch OIHW weights into kernel layouts (tap-major for the 3x3s)
    w1 = params["w_ca1"][:, :, 0, 0]                                         # (Cmid, C)
    w2 = params["w_ca2"][:, :, 0, 0]                                         # (C, Cmid)
    ws1 = jnp.transpose(params["w_sa1"], (2, 3, 0, 1)).reshape(9, Cmid, C)   # (9, Cmid, C)
    ws2 = jnp.transpose(params["w_sa2"], (2, 3, 0, 1)).reshape(9, Cmid)      # (9, Cmid)
    wo = params["w_out"][:, :, 0, 0]                                         # (1, C)
    bb = params["b_out"].reshape(1)                                          # (1,) scalar

    kernel = _make_wa_kernel(H, W, Bblk, C, Cmid)

    out_flat = pl.pallas_call(
        kernel,
        out_shape=jax.ShapeDtypeStruct((B, 1, HW), jnp.float32),
        grid=grid,
        in_specs=[
            pl.BlockSpec((Bblk, C, HW), lambda b: (b, 0, 0)),
            pl.BlockSpec((Bblk, C, HW), lambda b: (b, 0, 0)),
            pl.BlockSpec((Cmid, C), lambda b: (0, 0)),
            pl.BlockSpec((C, Cmid), lambda b: (0, 0)),
            pl.BlockSpec((9, Cmid, C), lambda b: (0, 0, 0)),
            pl.BlockSpec((9, Cmid), lambda b: (0, 0)),
            pl.BlockSpec((1, C), lambda b: (0, 0)),
            pl.BlockSpec(memory_space=pltpu.MemorySpace.SMEM),
        ],
        out_specs=pl.BlockSpec((Bblk, 1, HW), lambda b: (b, 0, 0)),
        compiler_params=pltpu.CompilerParams(
            dimension_semantics=("parallel",),
            vmem_limit_bytes=32 * 1024 * 1024),
    )(l_flat, g_flat, w1, w2, ws1, ws2, wo, bb)

    return out_flat.reshape(B, 1, H, W)


def reference_forward(local_feat, global_feat, params):
    """Pure-JAX NCHW reference mirroring the PyTorch module exactly."""
    dn = ("NCHW", "OIHW", "NCHW")

    def conv(x, w, pad):
        return jax.lax.conv_general_dilated(
            x, w, (1, 1), pad, dimension_numbers=dn,
            precision=jax.lax.Precision.HIGHEST)

    pooled = jnp.mean(global_feat, axis=(2, 3), keepdims=True)
    ca = jax.nn.sigmoid(
        conv(jnp.maximum(conv(pooled, params["w_ca1"], "VALID"), 0.0),
             params["w_ca2"], "VALID"))
    sa = jax.nn.sigmoid(
        conv(jnp.maximum(conv(global_feat, params["w_sa1"], "SAME"), 0.0),
             params["w_sa2"], "SAME"))
    end_local = sa * (ca * local_feat)
    return conv(end_local, params["w_out"], "VALID") + params["b_out"].reshape(1, 1, 1, 1)


if __name__ == "__main__":
    B, C, H, W = 2, 8, 16, 16
    Cmid = C // 2

    key = jax.random.PRNGKey(0)
    ks = jax.random.split(key, 8)

    # deterministic synthetic parameters (PyTorch OIHW layout)
    params = {
        "w_ca1": 0.1 * jax.random.normal(ks[0], (Cmid, C, 1, 1), jnp.float32),
        "w_ca2": 0.1 * jax.random.normal(ks[1], (C, Cmid, 1, 1), jnp.float32),
        "w_sa1": 0.1 * jax.random.normal(ks[2], (Cmid, C, 3, 3), jnp.float32),
        "w_sa2": 0.1 * jax.random.normal(ks[3], (1, Cmid, 3, 3), jnp.float32),
        "w_out": 0.1 * jax.random.normal(ks[4], (1, C, 1, 1), jnp.float32),
        "b_out": 0.1 * jax.random.normal(ks[5], (1,), jnp.float32),
    }

    local_feat = jax.random.normal(ks[6], (B, C, H, W), jnp.float32)
    global_feat = jax.random.normal(ks[7], (B, C, H, W), jnp.float32)

    out = wight_attendtion_forward(local_feat, global_feat, params)
    out = jax.block_until_ready(out)

    ref = jax.block_until_ready(reference_forward(local_feat, global_feat, params))
    assert out.shape == (B, 1, H, W), out.shape
    err = float(jnp.max(jnp.abs(out - ref)))
    assert jnp.allclose(out, ref, atol=5e-4, rtol=5e-4), err

    print("KERNEL_OK")
</pallas_src>

<mosaic_0001>
module attributes {stable_mosaic.version = 11 : i64} {
  func.func @kernel(%arg0: i32, %arg1: memref<1x8x256xf32, #tpu.memory_space<vmem>>, %arg2: memref<1x8x256xf32, #tpu.memory_space<vmem>>, %arg3: memref<4x8xf32, #tpu.memory_space<vmem>>, %arg4: memref<8x4xf32, #tpu.memory_space<vmem>>, %arg5: memref<9x4x8xf32, #tpu.memory_space<vmem>>, %arg6: memref<9x4xf32, #tpu.memory_space<vmem>>, %arg7: memref<1x8xf32, #tpu.memory_space<vmem>>, %arg8: memref<1xf32, #tpu.memory_space<smem>>, %arg9: memref<1x1x256xf32, #tpu.memory_space<vmem>>) attributes {dimension_semantics = [#tpu.dimension_semantics<parallel>], iteration_bounds = array<i64: 2>, scalar_prefetch = 0 : i64, scratch_operands = 0 : i64, tpu.core_type = #tpu.core_type<tc>, window_params = [{transform_indices = @transform_0, window_bounds = array<i64: 1, 8, 256>}, {transform_indices = @transform_1, window_bounds = array<i64: 1, 8, 256>}, {pipeline_mode = #tpu.pipeline_mode<synchronous>, transform_indices = @transform_2, window_bounds = array<i64: 4, 8>}, {pipeline_mode = #tpu.pipeline_mode<synchronous>, transform_indices = @transform_3, window_bounds = array<i64: 8, 4>}, {pipeline_mode = #tpu.pipeline_mode<synchronous>, transform_indices = @transform_4, window_bounds = array<i64: 9, 4, 8>}, {pipeline_mode = #tpu.pipeline_mode<synchronous>, transform_indices = @transform_5, window_bounds = array<i64: 9, 4>}, {pipeline_mode = #tpu.pipeline_mode<synchronous>, transform_indices = @transform_6, window_bounds = array<i64: 1, 8>}, {transform_indices = @transform_7, window_bounds = array<i64: 1>}, {transform_indices = @transform_8, window_bounds = array<i64: 1, 1, 256>}]} {
    %c0 = arith.constant 0 : index
    %c0_0 = arith.constant 0 : index
    %c0_1 = arith.constant 0 : index
    %0 = vector.load %arg1[%c0, %c0_0, %c0_1] : memref<1x8x256xf32, #tpu.memory_space<vmem>>, vector<1x8x256xf32>
    %c0_2 = arith.constant 0 : index
    %c0_3 = arith.constant 0 : index
    %c0_4 = arith.constant 0 : index
    %1 = vector.load %arg2[%c0_2, %c0_3, %c0_4] : memref<1x8x256xf32, #tpu.memory_space<vmem>>, vector<1x8x256xf32>
    %c0_5 = arith.constant 0 : index
    %c0_6 = arith.constant 0 : index
    %2 = vector.load %arg3[%c0_5, %c0_6] : memref<4x8xf32, #tpu.memory_space<vmem>>, vector<4x8xf32>
    %c0_7 = arith.constant 0 : index
    %c0_8 = arith.constant 0 : index
    %3 = vector.load %arg4[%c0_7, %c0_8] : memref<8x4xf32, #tpu.memory_space<vmem>>, vector<8x4xf32>
    %c0_9 = arith.constant 0 : index
    %c0_10 = arith.constant 0 : index
    %c0_11 = arith.constant 0 : index
    %4 = vector.load %arg5[%c0_9, %c0_10, %c0_11] : memref<9x4x8xf32, #tpu.memory_space<vmem>>, vector<9x4x8xf32>
    %c0_12 = arith.constant 0 : index
    %c0_13 = arith.constant 0 : index
    %5 = vector.load %arg6[%c0_12, %c0_13] : memref<9x4xf32, #tpu.memory_space<vmem>>, vector<9x4xf32>
    %c0_14 = arith.constant 0 : index
    %c0_15 = arith.constant 0 : index
    %6 = vector.load %arg7[%c0_14, %c0_15] : memref<1x8xf32, #tpu.memory_space<vmem>>, vector<1x8xf32>
    %7 = tpu.iota {dimensions = array<i32: 2>} : vector<1x1x256xi32>
    %c16_i32 = arith.constant 16 : i32
    %c0_i32 = arith.constant 0 : i32
    %8 = arith.cmpi eq, %c16_i32, %c0_i32 : i32
    %c1_i32 = arith.constant 1 : i32
    %9 = arith.select %8, %c1_i32, %c16_i32 : i32
    %10 = vector.broadcast %9 : i32 to vector<1x1x256xi32>
    %11 = arith.remsi %7, %10 : vector<1x1x256xi32>
    %c0_i32_16 = arith.constant 0 : i32
    %12 = vector.broadcast %c0_i32_16 : i32 to vector<1x1x256xi32>
    %13 = arith.cmpi ne, %11, %12 : vector<1x1x256xi32>
    %c0_i32_17 = arith.constant 0 : i32
    %14 = vector.broadcast %c0_i32_17 : i32 to vector<1x1x256xi32>
    %15 = arith.cmpi slt, %11, %14 : vector<1x1x256xi32>
    %c0_i32_18 = arith.constant 0 : i32
    %16 = arith.cmpi slt, %9, %c0_i32_18 : i32
    %17 = vector.broadcast %16 : i1 to vector<1x1x256xi1>
    %18 = vector.broadcast %17 : vector<1x1x256xi1> to vector<1x1x256xi1>
    %19 = arith.xori %15, %18 : vector<1x1x256xi1>
    %20 = arith.andi %19, %13 : vector<1x1x256xi1>
    %21 = vector.broadcast %9 : i32 to vector<1x1x256xi32>
    %22 = arith.addi %11, %21 : vector<1x1x256xi32>
    %23 = arith.select %20, %22, %11 : vector<1x1x256xi1>, vector<1x1x256xi32>
    %c1_i32_19 = arith.constant 1 : i32
    %24 = vector.broadcast %c1_i32_19 : i32 to vector<1x1x256xi32>
    %25 = arith.cmpi sge, %23, %24 : vector<1x1x256xi32>
    %c15_i32 = arith.constant 15 : i32
    %26 = vector.broadcast %c15_i32 : i32 to vector<1x1x256xi32>
    %27 = arith.cmpi slt, %23, %26 : vector<1x1x256xi32>
    %cst = arith.constant dense<0.000000e+00> : vector<1x8xf32>
    %28 = vector.multi_reduction <add>, %1, %cst [2] : vector<1x8x256xf32> to vector<1x8xf32>
    %cst_20 = arith.constant 3.906250e-03 : f32
    %29 = vector.broadcast %cst_20 : f32 to vector<1x8xf32>
    %30 = arith.mulf %28, %29 : vector<1x8xf32>
    %31 = vector.shape_cast %2 : vector<4x8xf32> to vector<1x4x8xf32>
    %32 = vector.shape_cast %30 : vector<1x8xf32> to vector<1x1x8xf32>
    %33 = vector.broadcast %32 : vector<1x1x8xf32> to vector<1x4x8xf32>
    %34 = arith.mulf %31, %33 : vector<1x4x8xf32>
    %cst_21 = arith.constant dense<0.000000e+00> : vector<1x4xf32>
    %35 = vector.multi_reduction <add>, %34, %cst_21 [2] : vector<1x4x8xf32> to vector<1x4xf32>
    %cst_22 = arith.constant 0.000000e+00 : f32
    %36 = vector.broadcast %cst_22 : f32 to vector<1x4xf32>
    %37 = arith.maximumf %35, %36 : vector<1x4xf32>
    %38 = vector.shape_cast %3 : vector<8x4xf32> to vector<1x8x4xf32>
    %39 = vector.shape_cast %37 : vector<1x4xf32> to vector<1x1x4xf32>
    %40 = vector.broadcast %39 : vector<1x1x4xf32> to vector<1x8x4xf32>
    %41 = arith.mulf %38, %40 : vector<1x8x4xf32>
    %cst_23 = arith.constant dense<0.000000e+00> : vector<1x8xf32>
    %42 = vector.multi_reduction <add>, %41, %cst_23 [2] : vector<1x8x4xf32> to vector<1x8xf32>
    %43 = arith.negf %42 : vector<1x8xf32>
    %44 = math.exp %43 : vector<1x8xf32>
    %cst_24 = arith.constant 1.000000e+00 : f32
    %45 = vector.broadcast %cst_24 : f32 to vector<1x8xf32>
    %46 = arith.addf %45, %44 : vector<1x8xf32>
    %47 = arith.divf %45, %46 : vector<1x8xf32>
    %cst_25 = arith.constant 0.000000e+00 : f32
    %48 = vector.broadcast %cst_25 : f32 to vector<1x256xf32>
    %cst_26 = arith.constant 0.000000e+00 : f32
    %49 = vector.broadcast %cst_26 : f32 to vector<1x256xf32>
    %cst_27 = arith.constant 0.000000e+00 : f32
    %50 = vector.broadcast %cst_27 : f32 to vector<1x256xf32>
    %cst_28 = arith.constant 0.000000e+00 : f32
    %51 = vector.broadcast %cst_28 : f32 to vector<1x256xf32>
    %cst_29 = arith.constant 0.000000e+00 : f32
    %52 = vector.broadcast %cst_29 : f32 to vector<1x8x17xf32>
    %53 = vector.extract_strided_slice %1 {offsets = [0, 0, 0], sizes = [1, 8, 239], strides = [1, 1, 1]} : vector<1x8x256xf32> to vector<1x8x239xf32>
    %54 = tpu.concatenate %52, %53 in 2 : vector<1x8x17xf32>, vector<1x8x239xf32> -> vector<1x8x256xf32>
    %cst_30 = arith.constant 0.000000e+00 : f32
    %55 = vector.shape_cast %25 : vector<1x1x256xi1> to vector<1x1x256xi1>
    %56 = vector.broadcast %55 : vector<1x1x256xi1> to vector<1x8x256xi1>
    %57 = vector.broadcast %cst_30 : f32 to vector<1x8x256xf32>
    %58 = arith.select %56, %54, %57 : vector<1x8x256xi1>, vector<1x8x256xf32>
    %59 = vector.extract_strided_slice %4 {offsets = [0, 0, 0], sizes = [1, 1, 8], strides = [1, 1, 1]} : vector<9x4x8xf32> to vector<1x1x8xf32>
    %60 = vector.shape_cast %59 : vector<1x1x8xf32> to vector<8xf32>
    %61 = vector.shape_cast %60 : vector<8xf32> to vector<1x8x1xf32>
    %62 = vector.broadcast %61 : vector<1x8x1xf32> to vector<1x8x256xf32>
    %63 = arith.mulf %58, %62 : vector<1x8x256xf32>
    %cst_31 = arith.constant dense<0.000000e+00> : vector<1x256xf32>
    %64 = vector.multi_reduction <add>, %63, %cst_31 [1] : vector<1x8x256xf32> to vector<1x256xf32>
    %65 = arith.addf %48, %64 : vector<1x256xf32>
    %66 = vector.extract_strided_slice %4 {offsets = [0, 1, 0], sizes = [1, 1, 8], strides = [1, 1, 1]} : vector<9x4x8xf32> to vector<1x1x8xf32>
    %67 = vector.shape_cast %66 : vector<1x1x8xf32> to vector<8xf32>
    %68 = vector.shape_cast %67 : vector<8xf32> to vector<1x8x1xf32>
    %69 = vector.broadcast %68 : vector<1x8x1xf32> to vector<1x8x256xf32>
    %70 = arith.mulf %58, %69 : vector<1x8x256xf32>
    %cst_32 = arith.constant dense<0.000000e+00> : vector<1x256xf32>
    %71 = vector.multi_reduction <add>, %70, %cst_32 [1] : vector<1x8x256xf32> to vector<1x256xf32>
    %72 = arith.addf %49, %71 : vector<1x256xf32>
    %73 = vector.extract_strided_slice %4 {offsets = [0, 2, 0], sizes = [1, 1, 8], strides = [1, 1, 1]} : vector<9x4x8xf32> to vector<1x1x8xf32>
    %74 = vector.shape_cast %73 : vector<1x1x8xf32> to vector<8xf32>
    %75 = vector.shape_cast %74 : vector<8xf32> to vector<1x8x1xf32>
    %76 = vector.broadcast %75 : vector<1x8x1xf32> to vector<1x8x256xf32>
    %77 = arith.mulf %58, %76 : vector<1x8x256xf32>
    %cst_33 = arith.constant dense<0.000000e+00> : vector<1x256xf32>
    %78 = vector.multi_reduction <add>, %77, %cst_33 [1] : vector<1x8x256xf32> to vector<1x256xf32>
    %79 = arith.addf %50, %78 : vector<1x256xf32>
    %80 = vector.extract_strided_slice %4 {offsets = [0, 3, 0], sizes = [1, 1, 8], strides = [1, 1, 1]} : vector<9x4x8xf32> to vector<1x1x8xf32>
    %81 = vector.shape_cast %80 : vector<1x1x8xf32> to vector<8xf32>
    %82 = vector.shape_cast %81 : vector<8xf32> to vector<1x8x1xf32>
    %83 = vector.broadcast %82 : vector<1x8x1xf32> to vector<1x8x256xf32>
    %84 = arith.mulf %58, %83 : vector<1x8x256xf32>
    %cst_34 = arith.constant dense<0.000000e+00> : vector<1x256xf32>
    %85 = vector.multi_reduction <add>, %84, %cst_34 [1] : vector<1x8x256xf32> to vector<1x256xf32>
    %86 = arith.addf %51, %85 : vector<1x256xf32>
    %cst_35 = arith.constant 0.000000e+00 : f32
    %87 = vector.broadcast %cst_35 : f32 to vector<1x8x16xf32>
    %88 = vector.extract_strided_slice %1 {offsets = [0, 0, 0], sizes = [1, 8, 240], strides = [1, 1, 1]} : vector<1x8x256xf32> to vector<1x8x240xf32>
    %89 = tpu.concatenate %87, %88 in 2 : vector<1x8x16xf32>, vector<1x8x240xf32> -> vector<1x8x256xf32>
    %90 = vector.extract_strided_slice %4 {offsets = [1, 0, 0], sizes = [1, 1, 8], strides = [1, 1, 1]} : vector<9x4x8xf32> to vector<1x1x8xf32>
    %91 = vector.shape_cast %90 : vector<1x1x8xf32> to vector<8xf32>
    %92 = vector.shape_cast %91 : vector<8xf32> to vector<1x8x1xf32>
    %93 = vector.broadcast %92 : vector<1x8x1xf32> to vector<1x8x256xf32>
    %94 = arith.mulf %89, %93 : vector<1x8x256xf32>
    %cst_36 = arith.constant dense<0.000000e+00> : vector<1x256xf32>
    %95 = vector.multi_reduction <add>, %94, %cst_36 [1] : vector<1x8x256xf32> to vector<1x256xf32>
    %96 = arith.addf %65, %95 : vector<1x256xf32>
    %97 = vector.extract_strided_slice %4 {offsets = [1, 1, 0], sizes = [1, 1, 8], strides = [1, 1, 1]} : vector<9x4x8xf32> to vector<1x1x8xf32>
    %98 = vector.shape_cast %97 : vector<1x1x8xf32> to vector<8xf32>
    %99 = vector.shape_cast %98 : vector<8xf32> to vector<1x8x1xf32>
    %100 = vector.broadcast %99 : vector<1x8x1xf32> to vector<1x8x256xf32>
    %101 = arith.mulf %89, %100 : vector<1x8x256xf32>
    %cst_37 = arith.constant dense<0.000000e+00> : vector<1x256xf32>
    %102 = vector.multi_reduction <add>, %101, %cst_37 [1] : vector<1x8x256xf32> to vector<1x256xf32>
    %103 = arith.addf %72, %102 : vector<1x256xf32>
    %104 = vector.extract_strided_slice %4 {offsets = [1, 2, 0], sizes = [1, 1, 8], strides = [1, 1, 1]} : vector<9x4x8xf32> to vector<1x1x8xf32>
    %105 = vector.shape_cast %104 : vector<1x1x8xf32> to vector<8xf32>
    %106 = vector.shape_cast %105 : vector<8xf32> to vector<1x8x1xf32>
    %107 = vector.broadcast %106 : vector<1x8x1xf32> to vector<1x8x256xf32>
    %108 = arith.mulf %89, %107 : vector<1x8x256xf32>
    %cst_38 = arith.constant dense<0.000000e+00> : vector<1x256xf32>
    %109 = vector.multi_reduction <add>, %108, %cst_38 [1] : vector<1x8x256xf32> to vector<1x256xf32>
    %110 = arith.addf %79, %109 : vector<1x256xf32>
    %111 = vector.extract_strided_slice %4 {offsets = [1, 3, 0], sizes = [1, 1, 8], strides = [1, 1, 1]} : vector<9x4x8xf32> to vector<1x1x8xf32>
    %112 = vector.shape_cast %111 : vector<1x1x8xf32> to vector<8xf32>
    %113 = vector.shape_cast %112 : vector<8xf32> to vector<1x8x1xf32>
    %114 = vector.broadcast %113 : vector<1x8x1xf32> to vector<1x8x256xf32>
    %115 = arith.mulf %89, %114 : vector<1x8x256xf32>
    %cst_39 = arith.constant dense<0.000000e+00> : vector<1x256xf32>
    %116 = vector.multi_reduction <add>, %115, %cst_39 [1] : vector<1x8x256xf32> to vector<1x256xf32>
    %117 = arith.addf %86, %116 : vector<1x256xf32>
    %cst_40 = arith.constant 0.000000e+00 : f32
    %118 = vector.broadcast %cst_40 : f32 to vector<1x8x15xf32>
    %119 = vector.extract_strided_slice %1 {offsets = [0, 0, 0], sizes = [1, 8, 241], strides = [1, 1, 1]} : vector<1x8x256xf32> to vector<1x8x241xf32>
    %120 = tpu.concatenate %118, %119 in 2 : vector<1x8x15xf32>, vector<1x8x241xf32> -> vector<1x8x256xf32>
    %cst_41 = arith.constant 0.000000e+00 : f32
    %121 = vector.shape_cast %27 : vector<1x1x256xi1> to vector<1x1x256xi1>
    %122 = vector.broadcast %121 : vector<1x1x256xi1> to vector<1x8x256xi1>
    %123 = vector.broadcast %cst_41 : f32 to vector<1x8x256xf32>
    %124 = arith.select %122, %120, %123 : vector<1x8x256xi1>, vector<1x8x256xf32>
    %125 = vector.extract_strided_slice %4 {offsets = [2, 0, 0], sizes = [1, 1, 8], strides = [1, 1, 1]} : vector<9x4x8xf32> to vector<1x1x8xf32>
    %126 = vector.shape_cast %125 : vector<1x1x8xf32> to vector<8xf32>
    %127 = vector.shape_cast %126 : vector<8xf32> to vector<1x8x1xf32>
    %128 = vector.broadcast %127 : vector<1x8x1xf32> to vector<1x8x256xf32>
    %129 = arith.mulf %124, %128 : vector<1x8x256xf32>
    %cst_42 = arith.constant dense<0.000000e+00> : vector<1x256xf32>
    %130 = vector.multi_reduction <add>, %129, %cst_42 [1] : vector<1x8x256xf32> to vector<1x256xf32>
    %131 = arith.addf %96, %130 : vector<1x256xf32>
    %132 = vector.extract_strided_slice %4 {offsets = [2, 1, 0], sizes = [1, 1, 8], strides = [1, 1, 1]} : vector<9x4x8xf32> to vector<1x1x8xf32>
    %133 = vector.shape_cast %132 : vector<1x1x8xf32> to vector<8xf32>
    %134 = vector.shape_cast %133 : vector<8xf32> to vector<1x8x1xf32>
    %135 = vector.broadcast %134 : vector<1x8x1xf32> to vector<1x8x256xf32>
    %136 = arith.mulf %124, %135 : vector<1x8x256xf32>
    %cst_43 = arith.constant dense<0.000000e+00> : vector<1x256xf32>
    %137 = vector.multi_reduction <add>, %136, %cst_43 [1] : vector<1x8x256xf32> to vector<1x256xf32>
    %138 = arith.addf %103, %137 : vector<1x256xf32>
    %139 = vector.extract_strided_slice %4 {offsets = [2, 2, 0], sizes = [1, 1, 8], strides = [1, 1, 1]} : vector<9x4x8xf32> to vector<1x1x8xf32>
    %140 = vector.shape_cast %139 : vector<1x1x8xf32> to vector<8xf32>
    %141 = vector.shape_cast %140 : vector<8xf32> to vector<1x8x1xf32>
    %142 = vector.broadcast %141 : vector<1x8x1xf32> to vector<1x8x256xf32>
    %143 = arith.mulf %124, %142 : vector<1x8x256xf32>
    %cst_44 = arith.constant dense<0.000000e+00> : vector<1x256xf32>
    %144 = vector.multi_reduction <add>, %143, %cst_44 [1] : vector<1x8x256xf32> to vector<1x256xf32>
    %145 = arith.addf %110, %144 : vector<1x256xf32>
    %146 = vector.extract_strided_slice %4 {offsets = [2, 3, 0], sizes = [1, 1, 8], strides = [1, 1, 1]} : vector<9x4x8xf32> to vector<1x1x8xf32>
    %147 = vector.shape_cast %146 : vector<1x1x8xf32> to vector<8xf32>
    %148 = vector.shape_cast %147 : vector<8xf32> to vector<1x8x1xf32>
    %149 = vector.broadcast %148 : vector<1x8x1xf32> to vector<1x8x256xf32>
    %150 = arith.mulf %124, %149 : vector<1x8x256xf32>
    %cst_45 = arith.constant dense<0.000000e+00> : vector<1x256xf32>
    %151 = vector.multi_reduction <add>, %150, %cst_45 [1] : vector<1x8x256xf32> to vector<1x256xf32>
    %152 = arith.addf %117, %151 : vector<1x256xf32>
    %cst_46 = arith.constant 0.000000e+00 : f32
    %153 = vector.broadcast %cst_46 : f32 to vector<1x8x1xf32>
    %154 = vector.extract_strided_slice %1 {offsets = [0, 0, 0], sizes = [1, 8, 255], strides = [1, 1, 1]} : vector<1x8x256xf32> to vector<1x8x255xf32>
    %155 = tpu.concatenate %153, %154 in 2 : vector<1x8x1xf32>, vector<1x8x255xf32> -> vector<1x8x256xf32>
    %cst_47 = arith.constant 0.000000e+00 : f32
    %156 = vector.shape_cast %25 : vector<1x1x256xi1> to vector<1x1x256xi1>
    %157 = vector.broadcast %156 : vector<1x1x256xi1> to vector<1x8x256xi1>
    %158 = vector.broadcast %cst_47 : f32 to vector<1x8x256xf32>
    %159 = arith.select %157, %155, %158 : vector<1x8x256xi1>, vector<1x8x256xf32>
    %160 = vector.extract_strided_slice %4 {offsets = [3, 0, 0], sizes = [1, 1, 8], strides = [1, 1, 1]} : vector<9x4x8xf32> to vector<1x1x8xf32>
    %161 = vector.shape_cast %160 : vector<1x1x8xf32> to vector<8xf32>
    %162 = vector.shape_cast %161 : vector<8xf32> to vector<1x8x1xf32>
    %163 = vector.broadcast %162 : vector<1x8x1xf32> to vector<1x8x256xf32>
    %164 = arith.mulf %159, %163 : vector<1x8x256xf32>
    %cst_48 = arith.constant dense<0.000000e+00> : vector<1x256xf32>
    %165 = vector.multi_reduction <add>, %164, %cst_48 [1] : vector<1x8x256xf32> to vector<1x256xf32>
    %166 = arith.addf %131, %165 : vector<1x256xf32>
    %167 = vector.extract_strided_slice %4 {offsets = [3, 1, 0], sizes = [1, 1, 8], strides = [1, 1, 1]} : vector<9x4x8xf32> to vector<1x1x8xf32>
    %168 = vector.shape_cast %167 : vector<1x1x8xf32> to vector<8xf32>
    %169 = vector.shape_cast %168 : vector<8xf32> to vector<1x8x1xf32>
    %170 = vector.broadcast %169 : vector<1x8x1xf32> to vector<1x8x256xf32>
    %171 = arith.mulf %159, %170 : vector<1x8x256xf32>
    %cst_49 = arith.constant dense<0.000000e+00> : vector<1x256xf32>
    %172 = vector.multi_reduction <add>, %171, %cst_49 [1] : vector<1x8x256xf32> to vector<1x256xf32>
    %173 = arith.addf %138, %172 : vector<1x256xf32>
    %174 = vector.extract_strided_slice %4 {offsets = [3, 2, 0], sizes = [1, 1, 8], strides = [1, 1, 1]} : vector<9x4x8xf32> to vector<1x1x8xf32>
    %175 = vector.shape_cast %174 : vector<1x1x8xf32> to vector<8xf32>
    %176 = vector.shape_cast %175 : vector<8xf32> to vector<1x8x1xf32>
    %177 = vector.broadcast %176 : vector<1x8x1xf32> to vector<1x8x256xf32>
    %178 = arith.mulf %159, %177 : vector<1x8x256xf32>
    %cst_50 = arith.constant dense<0.000000e+00> : vector<1x256xf32>
    %179 = vector.multi_reduction <add>, %178, %cst_50 [1] : vector<1x8x256xf32> to vector<1x256xf32>
    %180 = arith.addf %145, %179 : vector<1x256xf32>
    %181 = vector.extract_strided_slice %4 {offsets = [3, 3, 0], sizes = [1, 1, 8], strides = [1, 1, 1]} : vector<9x4x8xf32> to vector<1x1x8xf32>
    %182 = vector.shape_cast %181 : vector<1x1x8xf32> to vector<8xf32>
    %183 = vector.shape_cast %182 : vector<8xf32> to vector<1x8x1xf32>
    %184 = vector.broadcast %183 : vector<1x8x1xf32> to vector<1x8x256xf32>
    %185 = arith.mulf %159, %184 : vector<1x8x256xf32>
    %cst_51 = arith.constant dense<0.000000e+00> : vector<1x256xf32>
    %186 = vector.multi_reduction <add>, %185, %cst_51 [1] : vector<1x8x256xf32> to vector<1x256xf32>
    %187 = arith.addf %152, %186 : vector<1x256xf32>
    %188 = vector.extract_strided_slice %4 {offsets = [4, 0, 0], sizes = [1, 1, 8], strides = [1, 1, 1]} : vector<9x4x8xf32> to vector<1x1x8xf32>
    %189 = vector.shape_cast %188 : vector<1x1x8xf32> to vector<8xf32>
    %190 = vector.shape_cast %189 : vector<8xf32> to vector<1x8x1xf32>
    %191 = vector.broadcast %190 : vector<1x8x1xf32> to vector<1x8x256xf32>
    %192 = arith.mulf %1, %191 : vector<1x8x256xf32>
    %cst_52 = arith.constant dense<0.000000e+00> : vector<1x256xf32>
    %193 = vector.multi_reduction <add>, %192, %cst_52 [1] : vector<1x8x256xf32> to vector<1x256xf32>
    %194 = arith.addf %166, %193 : vector<1x256xf32>
    %195 = vector.extract_strided_slice %4 {offsets = [4, 1, 0], sizes = [1, 1, 8], strides = [1, 1, 1]} : vector<9x4x8xf32> to vector<1x1x8xf32>
    %196 = vector.shape_cast %195 : vector<1x1x8xf32> to vector<8xf32>
    %197 = vector.shape_cast %196 : vector<8xf32> to vector<1x8x1xf32>
    %198 = vector.broadcast %197 : vector<1x8x1xf32> to vector<1x8x256xf32>
    %199 = arith.mulf %1, %198 : vector<1x8x256xf32>
    %cst_53 = arith.constant dense<0.000000e+00> : vector<1x256xf32>
    %200 = vector.multi_reduction <add>, %199, %cst_53 [1] : vector<1x8x256xf32> to vector<1x256xf32>
    %201 = arith.addf %173, %200 : vector<1x256xf32>
    %202 = vector.extract_strided_slice %4 {offsets = [4, 2, 0], sizes = [1, 1, 8], strides = [1, 1, 1]} : vector<9x4x8xf32> to vector<1x1x8xf32>
    %203 = vector.shape_cast %202 : vector<1x1x8xf32> to vector<8xf32>
    %204 = vector.shape_cast %203 : vector<8xf32> to vector<1x8x1xf32>
    %205 = vector.broadcast %204 : vector<1x8x1xf32> to vector<1x8x256xf32>
    %206 = arith.mulf %1, %205 : vector<1x8x256xf32>
    %cst_54 = arith.constant dense<0.000000e+00> : vector<1x256xf32>
    %207 = vector.multi_reduction <add>, %206, %cst_54 [1] : vector<1x8x256xf32> to vector<1x256xf32>
    %208 = arith.addf %180, %207 : vector<1x256xf32>
    %209 = vector.extract_strided_slice %4 {offsets = [4, 3, 0], sizes = [1, 1, 8], strides = [1, 1, 1]} : vector<9x4x8xf32> to vector<1x1x8xf32>
    %210 = vector.shape_cast %209 : vector<1x1x8xf32> to vector<8xf32>
    %211 = vector.shape_cast %210 : vector<8xf32> to vector<1x8x1xf32>
    %212 = vector.broadcast %211 : vector<1x8x1xf32> to vector<1x8x256xf32>
    %213 = arith.mulf %1, %212 : vector<1x8x256xf32>
    %cst_55 = arith.constant dense<0.000000e+00> : vector<1x256xf32>
    %214 = vector.multi_reduction <add>, %213, %cst_55 [1] : vector<1x8x256xf32> to vector<1x256xf32>
    %215 = arith.addf %187, %214 : vector<1x256xf32>
    %216 = vector.extract_strided_slice %1 {offsets = [0, 0, 1], sizes = [1, 8, 255], strides = [1, 1, 1]} : vector<1x8x256xf32> to vector<1x8x255xf32>
    %cst_56 = arith.constant 0.000000e+00 : f32
    %217 = vector.broadcast %cst_56 : f32 to vector<1x8x1xf32>
    %218 = tpu.concatenate %216, %217 in 2 : vector<1x8x255xf32>, vector<1x8x1xf32> -> vector<1x8x256xf32>
    %cst_57 = arith.constant 0.000000e+00 : f32
    %219 = vector.shape_cast %27 : vector<1x1x256xi1> to vector<1x1x256xi1>
    %220 = vector.broadcast %219 : vector<1x1x256xi1> to vector<1x8x256xi1>
    %221 = vector.broadcast %cst_57 : f32 to vector<1x8x256xf32>
    %222 = arith.select %220, %218, %221 : vector<1x8x256xi1>, vector<1x8x256xf32>
    %223 = vector.extract_strided_slice %4 {offsets = [5, 0, 0], sizes = [1, 1, 8], strides = [1, 1, 1]} : vector<9x4x8xf32> to vector<1x1x8xf32>
    %224 = vector.shape_cast %223 : vector<1x1x8xf32> to vector<8xf32>
    %225 = vector.shape_cast %224 : vector<8xf32> to vector<1x8x1xf32>
    %226 = vector.broadcast %225 : vector<1x8x1xf32> to vector<1x8x256xf32>
    %227 = arith.mulf %222, %226 : vector<1x8x256xf32>
    %cst_58 = arith.constant dense<0.000000e+00> : vector<1x256xf32>
    %228 = vector.multi_reduction <add>, %227, %cst_58 [1] : vector<1x8x256xf32> to vector<1x256xf32>
    %229 = arith.addf %194, %228 : vector<1x256xf32>
    %230 = vector.extract_strided_slice %4 {offsets = [5, 1, 0], sizes = [1, 1, 8], strides = [1, 1, 1]} : vector<9x4x8xf32> to vector<1x1x8xf32>
    %231 = vector.shape_cast %230 : vector<1x1x8xf32> to vector<8xf32>
    %232 = vector.shape_cast %231 : vector<8xf32> to vector<1x8x1xf32>
    %233 = vector.broadcast %232 : vector<1x8x1xf32> to vector<1x8x256xf32>
    %234 = arith.mulf %222, %233 : vector<1x8x256xf32>
    %cst_59 = arith.constant dense<0.000000e+00> : vector<1x256xf32>
    %235 = vector.multi_reduction <add>, %234, %cst_59 [1] : vector<1x8x256xf32> to vector<1x256xf32>
    %236 = arith.addf %201, %235 : vector<1x256xf32>
    %237 = vector.extract_strided_slice %4 {offsets = [5, 2, 0], sizes = [1, 1, 8], strides = [1, 1, 1]} : vector<9x4x8xf32> to vector<1x1x8xf32>
    %238 = vector.shape_cast %237 : vector<1x1x8xf32> to vector<8xf32>
    %239 = vector.shape_cast %238 : vector<8xf32> to vector<1x8x1xf32>
    %240 = vector.broadcast %239 : vector<1x8x1xf32> to vector<1x8x256xf32>
    %241 = arith.mulf %222, %240 : vector<1x8x256xf32>
    %cst_60 = arith.constant dense<0.000000e+00> : vector<1x256xf32>
    %242 = vector.multi_reduction <add>, %241, %cst_60 [1] : vector<1x8x256xf32> to vector<1x256xf32>
    %243 = arith.addf %208, %242 : vector<1x256xf32>
    %244 = vector.extract_strided_slice %4 {offsets = [5, 3, 0], sizes = [1, 1, 8], strides = [1, 1, 1]} : vector<9x4x8xf32> to vector<1x1x8xf32>
    %245 = vector.shape_cast %244 : vector<1x1x8xf32> to vector<8xf32>
    %246 = vector.shape_cast %245 : vector<8xf32> to vector<1x8x1xf32>
    %247 = vector.broadcast %246 : vector<1x8x1xf32> to vector<1x8x256xf32>
    %248 = arith.mulf %222, %247 : vector<1x8x256xf32>
    %cst_61 = arith.constant dense<0.000000e+00> : vector<1x256xf32>
    %249 = vector.multi_reduction <add>, %248, %cst_61 [1] : vector<1x8x256xf32> to vector<1x256xf32>
    %250 = arith.addf %215, %249 : vector<1x256xf32>
    %251 = vector.extract_strided_slice %1 {offsets = [0, 0, 15], sizes = [1, 8, 241], strides = [1, 1, 1]} : vector<1x8x256xf32> to vector<1x8x241xf32>
    %cst_62 = arith.constant 0.000000e+00 : f32
    %252 = vector.broadcast %cst_62 : f32 to vector<1x8x15xf32>
    %253 = tpu.concatenate %251, %252 in 2 : vector<1x8x241xf32>, vector<1x8x15xf32> -> vector<1x8x256xf32>
    %cst_63 = arith.constant 0.000000e+00 : f32
    %254 = vector.shape_cast %25 : vector<1x1x256xi1> to vector<1x1x256xi1>
    %255 = vector.broadcast %254 : vector<1x1x256xi1> to vector<1x8x256xi1>
    %256 = vector.broadcast %cst_63 : f32 to vector<1x8x256xf32>
    %257 = arith.select %255, %253, %256 : vector<1x8x256xi1>, vector<1x8x256xf32>
    %258 = vector.extract_strided_slice %4 {offsets = [6, 0, 0], sizes = [1, 1, 8], strides = [1, 1, 1]} : vector<9x4x8xf32> to vector<1x1x8xf32>
    %259 = vector.shape_cast %258 : vector<1x1x8xf32> to vector<8xf32>
    %260 = vector.shape_cast %259 : vector<8xf32> to vector<1x8x1xf32>
    %261 = vector.broadcast %260 : vector<1x8x1xf32> to vector<1x8x256xf32>
    %262 = arith.mulf %257, %261 : vector<1x8x256xf32>
    %cst_64 = arith.constant dense<0.000000e+00> : vector<1x256xf32>
    %263 = vector.multi_reduction <add>, %262, %cst_64 [1] : vector<1x8x256xf32> to vector<1x256xf32>
    %264 = arith.addf %229, %263 : vector<1x256xf32>
    %265 = vector.extract_strided_slice %4 {offsets = [6, 1, 0], sizes = [1, 1, 8], strides = [1, 1, 1]} : vector<9x4x8xf32> to vector<1x1x8xf32>
    %266 = vector.shape_cast %265 : vector<1x1x8xf32> to vector<8xf32>
    %267 = vector.shape_cast %266 : vector<8xf32> to vector<1x8x1xf32>
    %268 = vector.broadcast %267 : vector<1x8x1xf32> to vector<1x8x256xf32>
    %269 = arith.mulf %257, %268 : vector<1x8x256xf32>
    %cst_65 = arith.constant dense<0.000000e+00> : vector<1x256xf32>
    %270 = vector.multi_reduction <add>, %269, %cst_65 [1] : vector<1x8x256xf32> to vector<1x256xf32>
    %271 = arith.addf %236, %270 : vector<1x256xf32>
    %272 = vector.extract_strided_slice %4 {offsets = [6, 2, 0], sizes = [1, 1, 8], strides = [1, 1, 1]} : vector<9x4x8xf32> to vector<1x1x8xf32>
    %273 = vector.shape_cast %272 : vector<1x1x8xf32> to vector<8xf32>
    %274 = vector.shape_cast %273 : vector<8xf32> to vector<1x8x1xf32>
    %275 = vector.broadcast %274 : vector<1x8x1xf32> to vector<1x8x256xf32>
    %276 = arith.mulf %257, %275 : vector<1x8x256xf32>
    %cst_66 = arith.constant dense<0.000000e+00> : vector<1x256xf32>
    %277 = vector.multi_reduction <add>, %276, %cst_66 [1] : vector<1x8x256xf32> to vector<1x256xf32>
    %278 = arith.addf %243, %277 : vector<1x256xf32>
    %279 = vector.extract_strided_slice %4 {offsets = [6, 3, 0], sizes = [1, 1, 8], strides = [1, 1, 1]} : vector<9x4x8xf32> to vector<1x1x8xf32>
    %280 = vector.shape_cast %279 : vector<1x1x8xf32> to vector<8xf32>
    %281 = vector.shape_cast %280 : vector<8xf32> to vector<1x8x1xf32>
    %282 = vector.broadcast %281 : vector<1x8x1xf32> to vector<1x8x256xf32>
    %283 = arith.mulf %257, %282 : vector<1x8x256xf32>
    %cst_67 = arith.constant dense<0.000000e+00> : vector<1x256xf32>
    %284 = vector.multi_reduction <add>, %283, %cst_67 [1] : vector<1x8x256xf32> to vector<1x256xf32>
    %285 = arith.addf %250, %284 : vector<1x256xf32>
    %286 = vector.extract_strided_slice %1 {offsets = [0, 0, 16], sizes = [1, 8, 240], strides = [1, 1, 1]} : vector<1x8x256xf32> to vector<1x8x240xf32>
    %cst_68 = arith.constant 0.000000e+00 : f32
    %287 = vector.broadcast %cst_68 : f32 to vector<1x8x16xf32>
    %288 = tpu.concatenate %286, %287 in 2 : vector<1x8x240xf32>, vector<1x8x16xf32> -> vector<1x8x256xf32>
    %289 = vector.extract_strided_slice %4 {offsets = [7, 0, 0], sizes = [1, 1, 8], strides = [1, 1, 1]} : vector<9x4x8xf32> to vector<1x1x8xf32>
    %290 = vector.shape_cast %289 : vector<1x1x8xf32> to vector<8xf32>
    %291 = vector.shape_cast %290 : vector<8xf32> to vector<1x8x1xf32>
    %292 = vector.broadcast %291 : vector<1x8x1xf32> to vector<1x8x256xf32>
    %293 = arith.mulf %288, %292 : vector<1x8x256xf32>
    %cst_69 = arith.constant dense<0.000000e+00> : vector<1x256xf32>
    %294 = vector.multi_reduction <add>, %293, %cst_69 [1] : vector<1x8x256xf32> to vector<1x256xf32>
    %295 = arith.addf %264, %294 : vector<1x256xf32>
    %296 = vector.extract_strided_slice %4 {offsets = [7, 1, 0], sizes = [1, 1, 8], strides = [1, 1, 1]} : vector<9x4x8xf32> to vector<1x1x8xf32>
    %297 = vector.shape_cast %296 : vector<1x1x8xf32> to vector<8xf32>
    %298 = vector.shape_cast %297 : vector<8xf32> to vector<1x8x1xf32>
    %299 = vector.broadcast %298 : vector<1x8x1xf32> to vector<1x8x256xf32>
    %300 = arith.mulf %288, %299 : vector<1x8x256xf32>
    %cst_70 = arith.constant dense<0.000000e+00> : vector<1x256xf32>
    %301 = vector.multi_reduction <add>, %300, %cst_70 [1] : vector<1x8x256xf32> to vector<1x256xf32>
    %302 = arith.addf %271, %301 : vector<1x256xf32>
    %303 = vector.extract_strided_slice %4 {offsets = [7, 2, 0], sizes = [1, 1, 8], strides = [1, 1, 1]} : vector<9x4x8xf32> to vector<1x1x8xf32>
    %304 = vector.shape_cast %303 : vector<1x1x8xf32> to vector<8xf32>
    %305 = vector.shape_cast %304 : vector<8xf32> to vector<1x8x1xf32>
    %306 = vector.broadcast %305 : vector<1x8x1xf32> to vector<1x8x256xf32>
    %307 = arith.mulf %288, %306 : vector<1x8x256xf32>
    %cst_71 = arith.constant dense<0.000000e+00> : vector<1x256xf32>
    %308 = vector.multi_reduction <add>, %307, %cst_71 [1] : vector<1x8x256xf32> to vector<1x256xf32>
    %309 = arith.addf %278, %308 : vector<1x256xf32>
    %310 = vector.extract_strided_slice %4 {offsets = [7, 3, 0], sizes = [1, 1, 8], strides = [1, 1, 1]} : vector<9x4x8xf32> to vector<1x1x8xf32>
    %311 = vector.shape_cast %310 : vector<1x1x8xf32> to vector<8xf32>
    %312 = vector.shape_cast %311 : vector<8xf32> to vector<1x8x1xf32>
    %313 = vector.broadcast %312 : vector<1x8x1xf32> to vector<1x8x256xf32>
    %314 = arith.mulf %288, %313 : vector<1x8x256xf32>
    %cst_72 = arith.constant dense<0.000000e+00> : vector<1x256xf32>
    %315 = vector.multi_reduction <add>, %314, %cst_72 [1] : vector<1x8x256xf32> to vector<1x256xf32>
    %316 = arith.addf %285, %315 : vector<1x256xf32>
    %317 = vector.extract_strided_slice %1 {offsets = [0, 0, 17], sizes = [1, 8, 239], strides = [1, 1, 1]} : vector<1x8x256xf32> to vector<1x8x239xf32>
    %cst_73 = arith.constant 0.000000e+00 : f32
    %318 = vector.broadcast %cst_73 : f32 to vector<1x8x17xf32>
    %319 = tpu.concatenate %317, %318 in 2 : vector<1x8x239xf32>, vector<1x8x17xf32> -> vector<1x8x256xf32>
    %cst_74 = arith.constant 0.000000e+00 : f32
    %320 = vector.shape_cast %27 : vector<1x1x256xi1> to vector<1x1x256xi1>
    %321 = vector.broadcast %320 : vector<1x1x256xi1> to vector<1x8x256xi1>
    %322 = vector.broadcast %cst_74 : f32 to vector<1x8x256xf32>
    %323 = arith.select %321, %319, %322 : vector<1x8x256xi1>, vector<1x8x256xf32>
    %324 = vector.extract_strided_slice %4 {offsets = [8, 0, 0], sizes = [1, 1, 8], strides = [1, 1, 1]} : vector<9x4x8xf32> to vector<1x1x8xf32>
    %325 = vector.shape_cast %324 : vector<1x1x8xf32> to vector<8xf32>
    %326 = vector.shape_cast %325 : vector<8xf32> to vector<1x8x1xf32>
    %327 = vector.broadcast %326 : vector<1x8x1xf32> to vector<1x8x256xf32>
    %328 = arith.mulf %323, %327 : vector<1x8x256xf32>
    %cst_75 = arith.constant dense<0.000000e+00> : vector<1x256xf32>
    %329 = vector.multi_reduction <add>, %328, %cst_75 [1] : vector<1x8x256xf32> to vector<1x256xf32>
    %330 = arith.addf %295, %329 : vector<1x256xf32>
    %331 = vector.extract_strided_slice %4 {offsets = [8, 1, 0], sizes = [1, 1, 8], strides = [1, 1, 1]} : vector<9x4x8xf32> to vector<1x1x8xf32>
    %332 = vector.shape_cast %331 : vector<1x1x8xf32> to vector<8xf32>
    %333 = vector.shape_cast %332 : vector<8xf32> to vector<1x8x1xf32>
    %334 = vector.broadcast %333 : vector<1x8x1xf32> to vector<1x8x256xf32>
    %335 = arith.mulf %323, %334 : vector<1x8x256xf32>
    %cst_76 = arith.constant dense<0.000000e+00> : vector<1x256xf32>
    %336 = vector.multi_reduction <add>, %335, %cst_76 [1] : vector<1x8x256xf32> to vector<1x256xf32>
    %337 = arith.addf %302, %336 : vector<1x256xf32>
    %338 = vector.extract_strided_slice %4 {offsets = [8, 2, 0], sizes = [1, 1, 8], strides = [1, 1, 1]} : vector<9x4x8xf32> to vector<1x1x8xf32>
    %339 = vector.shape_cast %338 : vector<1x1x8xf32> to vector<8xf32>
    %340 = vector.shape_cast %339 : vector<8xf32> to vector<1x8x1xf32>
    %341 = vector.broadcast %340 : vector<1x8x1xf32> to vector<1x8x256xf32>
    %342 = arith.mulf %323, %341 : vector<1x8x256xf32>
    %cst_77 = arith.constant dense<0.000000e+00> : vector<1x256xf32>
    %343 = vector.multi_reduction <add>, %342, %cst_77 [1] : vector<1x8x256xf32> to vector<1x256xf32>
    %344 = arith.addf %309, %343 : vector<1x256xf32>
    %345 = vector.extract_strided_slice %4 {offsets = [8, 3, 0], sizes = [1, 1, 8], strides = [1, 1, 1]} : vector<9x4x8xf32> to vector<1x1x8xf32>
    %346 = vector.shape_cast %345 : vector<1x1x8xf32> to vector<8xf32>
    %347 = vector.shape_cast %346 : vector<8xf32> to vector<1x8x1xf32>
    %348 = vector.broadcast %347 : vector<1x8x1xf32> to vector<1x8x256xf32>
    %349 = arith.mulf %323, %348 : vector<1x8x256xf32>
    %cst_78 = arith.constant dense<0.000000e+00> : vector<1x256xf32>
    %350 = vector.multi_reduction <add>, %349, %cst_78 [1] : vector<1x8x256xf32> to vector<1x256xf32>
    %351 = arith.addf %316, %350 : vector<1x256xf32>
    %352 = vector.shape_cast %330 : vector<1x256xf32> to vector<1x1x256xf32>
    %353 = vector.shape_cast %337 : vector<1x256xf32> to vector<1x1x256xf32>
    %354 = vector.shape_cast %344 : vector<1x256xf32> to vector<1x1x256xf32>
    %355 = vector.shape_cast %351 : vector<1x256xf32> to vector<1x1x256xf32>
    %356 = tpu.concatenate %352, %353, %354, %355 in 1 : vector<1x1x256xf32>, vector<1x1x256xf32>, vector<1x1x256xf32>, vector<1x1x256xf32> -> vector<1x4x256xf32>
    %cst_79 = arith.constant 0.000000e+00 : f32
    %357 = vector.broadcast %cst_79 : f32 to vector<1x4x256xf32>
    %358 = arith.maximumf %356, %357 : vector<1x4x256xf32>
    %cst_80 = arith.constant 0.000000e+00 : f32
    %359 = vector.broadcast %cst_80 : f32 to vector<1x256xf32>
    %cst_81 = arith.constant 0.000000e+00 : f32
    %360 = vector.broadcast %cst_81 : f32 to vector<1x4x17xf32>
    %361 = vector.extract_strided_slice %358 {offsets = [0, 0, 0], sizes = [1, 4, 239], strides = [1, 1, 1]} : vector<1x4x256xf32> to vector<1x4x239xf32>
    %362 = tpu.concatenate %360, %361 in 2 : vector<1x4x17xf32>, vector<1x4x239xf32> -> vector<1x4x256xf32>
    %cst_82 = arith.constant 0.000000e+00 : f32
    %363 = vector.shape_cast %25 : vector<1x1x256xi1> to vector<1x1x256xi1>
    %364 = vector.broadcast %363 : vector<1x1x256xi1> to vector<1x4x256xi1>
    %365 = vector.broadcast %cst_82 : f32 to vector<1x4x256xf32>
    %366 = arith.select %364, %362, %365 : vector<1x4x256xi1>, vector<1x4x256xf32>
    %367 = vector.extract_strided_slice %5 {offsets = [0, 0], sizes = [1, 4], strides = [1, 1]} : vector<9x4xf32> to vector<1x4xf32>
    %368 = vector.shape_cast %367 : vector<1x4xf32> to vector<4xf32>
    %369 = vector.shape_cast %368 : vector<4xf32> to vector<1x4x1xf32>
    %370 = vector.broadcast %369 : vector<1x4x1xf32> to vector<1x4x256xf32>
    %371 = arith.mulf %366, %370 : vector<1x4x256xf32>
    %cst_83 = arith.constant dense<0.000000e+00> : vector<1x256xf32>
    %372 = vector.multi_reduction <add>, %371, %cst_83 [1] : vector<1x4x256xf32> to vector<1x256xf32>
    %373 = arith.addf %359, %372 : vector<1x256xf32>
    %cst_84 = arith.constant 0.000000e+00 : f32
    %374 = vector.broadcast %cst_84 : f32 to vector<1x4x16xf32>
    %375 = vector.extract_strided_slice %358 {offsets = [0, 0, 0], sizes = [1, 4, 240], strides = [1, 1, 1]} : vector<1x4x256xf32> to vector<1x4x240xf32>
    %376 = tpu.concatenate %374, %375 in 2 : vector<1x4x16xf32>, vector<1x4x240xf32> -> vector<1x4x256xf32>
    %377 = vector.extract_strided_slice %5 {offsets = [1, 0], sizes = [1, 4], strides = [1, 1]} : vector<9x4xf32> to vector<1x4xf32>
    %378 = vector.shape_cast %377 : vector<1x4xf32> to vector<4xf32>
    %379 = vector.shape_cast %378 : vector<4xf32> to vector<1x4x1xf32>
    %380 = vector.broadcast %379 : vector<1x4x1xf32> to vector<1x4x256xf32>
    %381 = arith.mulf %376, %380 : vector<1x4x256xf32>
    %cst_85 = arith.constant dense<0.000000e+00> : vector<1x256xf32>
    %382 = vector.multi_reduction <add>, %381, %cst_85 [1] : vector<1x4x256xf32> to vector<1x256xf32>
    %383 = arith.addf %373, %382 : vector<1x256xf32>
    %cst_86 = arith.constant 0.000000e+00 : f32
    %384 = vector.broadcast %cst_86 : f32 to vector<1x4x15xf32>
    %385 = vector.extract_strided_slice %358 {offsets = [0, 0, 0], sizes = [1, 4, 241], strides = [1, 1, 1]} : vector<1x4x256xf32> to vector<1x4x241xf32>
    %386 = tpu.concatenate %384, %385 in 2 : vector<1x4x15xf32>, vector<1x4x241xf32> -> vector<1x4x256xf32>
    %cst_87 = arith.constant 0.000000e+00 : f32
    %387 = vector.shape_cast %27 : vector<1x1x256xi1> to vector<1x1x256xi1>
    %388 = vector.broadcast %387 : vector<1x1x256xi1> to vector<1x4x256xi1>
    %389 = vector.broadcast %cst_87 : f32 to vector<1x4x256xf32>
    %390 = arith.select %388, %386, %389 : vector<1x4x256xi1>, vector<1x4x256xf32>
    %391 = vector.extract_strided_slice %5 {offsets = [2, 0], sizes = [1, 4], strides = [1, 1]} : vector<9x4xf32> to vector<1x4xf32>
    %392 = vector.shape_cast %391 : vector<1x4xf32> to vector<4xf32>
    %393 = vector.shape_cast %392 : vector<4xf32> to vector<1x4x1xf32>
    %394 = vector.broadcast %393 : vector<1x4x1xf32> to vector<1x4x256xf32>
    %395 = arith.mulf %390, %394 : vector<1x4x256xf32>
    %cst_88 = arith.constant dense<0.000000e+00> : vector<1x256xf32>
    %396 = vector.multi_reduction <add>, %395, %cst_88 [1] : vector<1x4x256xf32> to vector<1x256xf32>
    %397 = arith.addf %383, %396 : vector<1x256xf32>
    %cst_89 = arith.constant 0.000000e+00 : f32
    %398 = vector.broadcast %cst_89 : f32 to vector<1x4x1xf32>
    %399 = vector.extract_strided_slice %358 {offsets = [0, 0, 0], sizes = [1, 4, 255], strides = [1, 1, 1]} : vector<1x4x256xf32> to vector<1x4x255xf32>
    %400 = tpu.concatenate %398, %399 in 2 : vector<1x4x1xf32>, vector<1x4x255xf32> -> vector<1x4x256xf32>
    %cst_90 = arith.constant 0.000000e+00 : f32
    %401 = vector.shape_cast %25 : vector<1x1x256xi1> to vector<1x1x256xi1>
    %402 = vector.broadcast %401 : vector<1x1x256xi1> to vector<1x4x256xi1>
    %403 = vector.broadcast %cst_90 : f32 to vector<1x4x256xf32>
    %404 = arith.select %402, %400, %403 : vector<1x4x256xi1>, vector<1x4x256xf32>
    %405 = vector.extract_strided_slice %5 {offsets = [3, 0], sizes = [1, 4], strides = [1, 1]} : vector<9x4xf32> to vector<1x4xf32>
    %406 = vector.shape_cast %405 : vector<1x4xf32> to vector<4xf32>
    %407 = vector.shape_cast %406 : vector<4xf32> to vector<1x4x1xf32>
    %408 = vector.broadcast %407 : vector<1x4x1xf32> to vector<1x4x256xf32>
    %409 = arith.mulf %404, %408 : vector<1x4x256xf32>
    %cst_91 = arith.constant dense<0.000000e+00> : vector<1x256xf32>
    %410 = vector.multi_reduction <add>, %409, %cst_91 [1] : vector<1x4x256xf32> to vector<1x256xf32>
    %411 = arith.addf %397, %410 : vector<1x256xf32>
    %412 = vector.extract_strided_slice %5 {offsets = [4, 0], sizes = [1, 4], strides = [1, 1]} : vector<9x4xf32> to vector<1x4xf32>
    %413 = vector.shape_cast %412 : vector<1x4xf32> to vector<4xf32>
    %414 = vector.shape_cast %413 : vector<4xf32> to vector<1x4x1xf32>
    %415 = vector.broadcast %414 : vector<1x4x1xf32> to vector<1x4x256xf32>
    %416 = arith.mulf %358, %415 : vector<1x4x256xf32>
    %cst_92 = arith.constant dense<0.000000e+00> : vector<1x256xf32>
    %417 = vector.multi_reduction <add>, %416, %cst_92 [1] : vector<1x4x256xf32> to vector<1x256xf32>
    %418 = arith.addf %411, %417 : vector<1x256xf32>
    %419 = vector.extract_strided_slice %358 {offsets = [0, 0, 1], sizes = [1, 4, 255], strides = [1, 1, 1]} : vector<1x4x256xf32> to vector<1x4x255xf32>
    %cst_93 = arith.constant 0.000000e+00 : f32
    %420 = vector.broadcast %cst_93 : f32 to vector<1x4x1xf32>
    %421 = tpu.concatenate %419, %420 in 2 : vector<1x4x255xf32>, vector<1x4x1xf32> -> vector<1x4x256xf32>
    %cst_94 = arith.constant 0.000000e+00 : f32
    %422 = vector.shape_cast %27 : vector<1x1x256xi1> to vector<1x1x256xi1>
    %423 = vector.broadcast %422 : vector<1x1x256xi1> to vector<1x4x256xi1>
    %424 = vector.broadcast %cst_94 : f32 to vector<1x4x256xf32>
    %425 = arith.select %423, %421, %424 : vector<1x4x256xi1>, vector<1x4x256xf32>
    %426 = vector.extract_strided_slice %5 {offsets = [5, 0], sizes = [1, 4], strides = [1, 1]} : vector<9x4xf32> to vector<1x4xf32>
    %427 = vector.shape_cast %426 : vector<1x4xf32> to vector<4xf32>
    %428 = vector.shape_cast %427 : vector<4xf32> to vector<1x4x1xf32>
    %429 = vector.broadcast %428 : vector<1x4x1xf32> to vector<1x4x256xf32>
    %430 = arith.mulf %425, %429 : vector<1x4x256xf32>
    %cst_95 = arith.constant dense<0.000000e+00> : vector<1x256xf32>
    %431 = vector.multi_reduction <add>, %430, %cst_95 [1] : vector<1x4x256xf32> to vector<1x256xf32>
    %432 = arith.addf %418, %431 : vector<1x256xf32>
    %433 = vector.extract_strided_slice %358 {offsets = [0, 0, 15], sizes = [1, 4, 241], strides = [1, 1, 1]} : vector<1x4x256xf32> to vector<1x4x241xf32>
    %cst_96 = arith.constant 0.000000e+00 : f32
    %434 = vector.broadcast %cst_96 : f32 to vector<1x4x15xf32>
    %435 = tpu.concatenate %433, %434 in 2 : vector<1x4x241xf32>, vector<1x4x15xf32> -> vector<1x4x256xf32>
    %cst_97 = arith.constant 0.000000e+00 : f32
    %436 = vector.shape_cast %25 : vector<1x1x256xi1> to vector<1x1x256xi1>
    %437 = vector.broadcast %436 : vector<1x1x256xi1> to vector<1x4x256xi1>
    %438 = vector.broadcast %cst_97 : f32 to vector<1x4x256xf32>
    %439 = arith.select %437, %435, %438 : vector<1x4x256xi1>, vector<1x4x256xf32>
    %440 = vector.extract_strided_slice %5 {offsets = [6, 0], sizes = [1, 4], strides = [1, 1]} : vector<9x4xf32> to vector<1x4xf32>
    %441 = vector.shape_cast %440 : vector<1x4xf32> to vector<4xf32>
    %442 = vector.shape_cast %441 : vector<4xf32> to vector<1x4x1xf32>
    %443 = vector.broadcast %442 : vector<1x4x1xf32> to vector<1x4x256xf32>
    %444 = arith.mulf %439, %443 : vector<1x4x256xf32>
    %cst_98 = arith.constant dense<0.000000e+00> : vector<1x256xf32>
    %445 = vector.multi_reduction <add>, %444, %cst_98 [1] : vector<1x4x256xf32> to vector<1x256xf32>
    %446 = arith.addf %432, %445 : vector<1x256xf32>
    %447 = vector.extract_strided_slice %358 {offsets = [0, 0, 16], sizes = [1, 4, 240], strides = [1, 1, 1]} : vector<1x4x256xf32> to vector<1x4x240xf32>
    %cst_99 = arith.constant 0.000000e+00 : f32
    %448 = vector.broadcast %cst_99 : f32 to vector<1x4x16xf32>
    %449 = tpu.concatenate %447, %448 in 2 : vector<1x4x240xf32>, vector<1x4x16xf32> -> vector<1x4x256xf32>
    %450 = vector.extract_strided_slice %5 {offsets = [7, 0], sizes = [1, 4], strides = [1, 1]} : vector<9x4xf32> to vector<1x4xf32>
    %451 = vector.shape_cast %450 : vector<1x4xf32> to vector<4xf32>
    %452 = vector.shape_cast %451 : vector<4xf32> to vector<1x4x1xf32>
    %453 = vector.broadcast %452 : vector<1x4x1xf32> to vector<1x4x256xf32>
    %454 = arith.mulf %449, %453 : vector<1x4x256xf32>
    %cst_100 = arith.constant dense<0.000000e+00> : vector<1x256xf32>
    %455 = vector.multi_reduction <add>, %454, %cst_100 [1] : vector<1x4x256xf32> to vector<1x256xf32>
    %456 = arith.addf %446, %455 : vector<1x256xf32>
    %457 = vector.extract_strided_slice %358 {offsets = [0, 0, 17], sizes = [1, 4, 239], strides = [1, 1, 1]} : vector<1x4x256xf32> to vector<1x4x239xf32>
    %cst_101 = arith.constant 0.000000e+00 : f32
    %458 = vector.broadcast %cst_101 : f32 to vector<1x4x17xf32>
    %459 = tpu.concatenate %457, %458 in 2 : vector<1x4x239xf32>, vector<1x4x17xf32> -> vector<1x4x256xf32>
    %cst_102 = arith.constant 0.000000e+00 : f32
    %460 = vector.shape_cast %27 : vector<1x1x256xi1> to vector<1x1x256xi1>
    %461 = vector.broadcast %460 : vector<1x1x256xi1> to vector<1x4x256xi1>
    %462 = vector.broadcast %cst_102 : f32 to vector<1x4x256xf32>
    %463 = arith.select %461, %459, %462 : vector<1x4x256xi1>, vector<1x4x256xf32>
    %464 = vector.extract_strided_slice %5 {offsets = [8, 0], sizes = [1, 4], strides = [1, 1]} : vector<9x4xf32> to vector<1x4xf32>
    %465 = vector.shape_cast %464 : vector<1x4xf32> to vector<4xf32>
    %466 = vector.shape_cast %465 : vector<4xf32> to vector<1x4x1xf32>
    %467 = vector.broadcast %466 : vector<1x4x1xf32> to vector<1x4x256xf32>
    %468 = arith.mulf %463, %467 : vector<1x4x256xf32>
    %cst_103 = arith.constant dense<0.000000e+00> : vector<1x256xf32>
    %469 = vector.multi_reduction <add>, %468, %cst_103 [1] : vector<1x4x256xf32> to vector<1x256xf32>
    %470 = arith.addf %456, %469 : vector<1x256xf32>
    %471 = arith.negf %470 : vector<1x256xf32>
    %472 = math.exp %471 : vector<1x256xf32>
    %cst_104 = arith.constant 1.000000e+00 : f32
    %473 = vector.broadcast %cst_104 : f32 to vector<1x256xf32>
    %474 = arith.addf %473, %472 : vector<1x256xf32>
    %475 = arith.divf %473, %474 : vector<1x256xf32>
    %476 = arith.mulf %47, %6 : vector<1x8xf32>
    %477 = vector.shape_cast %476 : vector<1x8xf32> to vector<1x8x1xf32>
    %478 = vector.broadcast %477 : vector<1x8x1xf32> to vector<1x8x256xf32>
    %479 = arith.mulf %478, %0 : vector<1x8x256xf32>
    %cst_105 = arith.constant dense<0.000000e+00> : vector<1x256xf32>
    %480 = vector.multi_reduction <add>, %479, %cst_105 [1] : vector<1x8x256xf32> to vector<1x256xf32>
    %481 = arith.mulf %475, %480 : vector<1x256xf32>
    %c0_106 = arith.constant 0 : index
    %482 = memref.load %arg8[%c0_106] : memref<1xf32, #tpu.memory_space<smem>>
    %483 = vector.broadcast %482 : f32 to vector<1x256xf32>
    %484 = arith.addf %481, %483 : vector<1x256xf32>
    %485 = vector.shape_cast %484 : vector<1x256xf32> to vector<1x1x256xf32>
    %c0_107 = arith.constant 0 : index
    %c0_108 = arith.constant 0 : index
    %c0_109 = arith.constant 0 : index
    %486 = vector.load %arg9[%c0_107, %c0_108, %c0_109] : memref<1x1x256xf32, #tpu.memory_space<vmem>>, vector<1x1x256xf32>
    tpu.vector_store %arg9[%c0_107, %c0_108, %c0_109], %485 {strides = array<i32>} : memref<1x1x256xf32, #tpu.memory_space<vmem>>, vector<1x1x256xf32>,
    return
  }
  func.func @transform_0(%arg0: i32) -> (i32, i32, i32) {
    %c0_i32 = arith.constant 0 : i32
    %c0_i32_0 = arith.constant 0 : i32
    %c0_i32_1 = arith.constant 0 : i32
    return %arg0, %c0_i32, %c0_i32_0 : i32, i32, i32
  }
  func.func @transform_1(%arg0: i32) -> (i32, i32, i32) {
    %c0_i32 = arith.constant 0 : i32
    %c0_i32_0 = arith.constant 0 : i32
    %c0_i32_1 = arith.constant 0 : i32
    return %arg0, %c0_i32, %c0_i32_0 : i32, i32, i32
  }
  func.func @transform_2(%arg0: i32) -> (i32, i32) {
    %c0_i32 = arith.constant 0 : i32
    %c0_i32_0 = arith.constant 0 : i32
    %c0_i32_1 = arith.constant 0 : i32
    return %c0_i32, %c0_i32_0 : i32, i32
  }
  func.func @transform_3(%arg0: i32) -> (i32, i32) {
    %c0_i32 = arith.constant 0 : i32
    %c0_i32_0 = arith.constant 0 : i32
    %c0_i32_1 = arith.constant 0 : i32
    return %c0_i32, %c0_i32_0 : i32, i32
  }
  func.func @transform_4(%arg0: i32) -> (i32, i32, i32) {
    %c0_i32 = arith.constant 0 : i32
    %c0_i32_0 = arith.constant 0 : i32
    %c0_i32_1 = arith.constant 0 : i32
    %c0_i32_2 = arith.constant 0 : i32
    return %c0_i32, %c0_i32_0, %c0_i32_1 : i32, i32, i32
  }
  func.func @transform_5(%arg0: i32) -> (i32, i32) {
    %c0_i32 = arith.constant 0 : i32
    %c0_i32_0 = arith.constant 0 : i32
    %c0_i32_1 = arith.constant 0 : i32
    return %c0_i32, %c0_i32_0 : i32, i32
  }
  func.func @transform_6(%arg0: i32) -> (i32, i32) {
    %c0_i32 = arith.constant 0 : i32
    %c0_i32_0 = arith.constant 0 : i32
    %c0_i32_1 = arith.constant 0 : i32
    return %c0_i32, %c0_i32_0 : i32, i32
  }
  func.func @transform_7(%arg0: i32) -> i32 {
    %c0_i32 = arith.constant 0 : i32
    %c0_i32_0 = arith.constant 0 : i32
    return %c0_i32 : i32
  }
  func.func @transform_8(%arg0: i32) -> (i32, i32, i32) {
    %c0_i32 = arith.constant 0 : i32
    %c0_i32_0 = arith.constant 0 : i32
    %c0_i32_1 = arith.constant 0 : i32
    return %arg0, %c0_i32, %c0_i32_0 : i32, i32, i32
  }
}

</mosaic_0001>

<bundles_post_ra>
// kernel: tpu_custom_call.1
= control target key start
LH: loop header
LB: loop body
LE: loop exit
PB: predicated region body
PF: predicated region fallthrough
CT: control target
= control target key end

     0   :  { %s2772_s0 = inlined_call_operand.vmem [shape: f32[2,8,256], index: 0, kind: input, shape index: {}]   ;;  %s2773_s1 = inlined_call_operand.vmem [shape: f32[2,8,256], index: 1, kind: input, shape index: {}]   ;;  %s2774_s2 = inlined_call_operand.vmem [shape: f32[4,8], index: 2, kind: input, shape index: {}]   ;;  %s2775_s3 = inlined_call_operand.vmem [shape: f32[8,4], index: 3, kind: input, shape index: {}]   ;;  %s2776_s4 = inlined_call_operand.vmem [shape: f32[9,4,8], index: 4, kind: input, shape index: {}]   ;;  %s2777_s5 = inlined_call_operand.vmem [shape: f32[9,4], index: 5, kind: input, shape index: {}]   ;;  %s2778_s6 = inlined_call_operand.vmem [shape: f32[1,8], index: 6, kind: input, shape index: {}]   ;;  %s2779_s7 = inlined_call_operand.<no memory space> [shape: f32[1], index: 7, kind: input, shape index: {}]   ;;  %s2780_s8 = inlined_call_operand.hbm [shape: f32[2,1,256], index: 8, kind: output, shape index: {}]  }
   0x1   :  { %13 = sst [smem:[#allocation2]] %s2779_s7 }
   0x2   :  { %14 = vsyncpa [#allocation4], 0 }
   0x3   :  { %16 = vsyncpa [#allocation4 + $0x1], 0  ;;  %s2022_s29 = smov 0   ;;  %s2024_s30 = smov 0  }
   0x4   :  { %s2026_s9 = smov 0   ;;  %s2028_s10 = smov 0  }
   0x5 LB: > { %s2043_s7 = sadd.s32 4294967295, %s1961_s10   ;;  %s1814_s11 = sadd.s32 4294967294, %s1961_s10   ;;  %s1961_s10 = sphi %s2028_s10, %s2819_s10   ;;  %s1957_s9 = sphi %s2026_s9, %s2818_s9   ;;  %s1953_s30 = sphi %s2024_s30, %s2817_s30   ;;  %s1949_s29 = sphi %s2022_s29, %s2816_s29  }
   0x6   : > { %s2047_s12 = sadd.s32 1, %s1961_s10   ;;  %s207_s13 = sadd.s32 1, %s1957_s9 }
   0x7   : > { %s204_s14 = ssub.s32 %s1961_s10, %s2047_s12  ;;  %p217_p0 = scmp.ne.s32.totalorder %s1957_s9, %s1953_s30 }
   0x8   : > { %p205_p1 = scmp.eq.s32.totalorder %s204_s14, 0  ;;  %p218_p2 = scmp.eq.s32.totalorder %s2043_s7, 1 }
   0x9   : > { %p223_p3 = scmp.ne.s32.totalorder %s1953_s30, %s1949_s29  ;;  %p224_p4 = scmp.eq.s32.totalorder %s1814_s11, 1 }
   0xa   : > { %s2058_s15 = scalar_select %p205_p1, %s1957_s9, %s207_s13  }
   0xb   : > { %p2060_p5 = por %p218_p2, %p217_p0  ;;  %p2064_p6 = por %p224_p4, %p223_p3 }
   0xc   : > { %p1817_p7 = scmp.ge.s32.totalorder %s1961_s10, 1  ;;  %p276_p8 = scmp.lt.s32.totalorder %s1961_s10, 3 }
   0xe   : > { %p277_p9 = pnand %p1817_p7, %p276_p8 }
  0x10   : > { %280 = sbr.rel (%p277_p9) target bundleno = 667 (0x29b), region = 52 }
  0x17   : > { %p315_p10 = scmp.lt.s32.totalorder %s2043_s7, 1  ;;  %v2781_v0 = vlaneseq  ;;  %s1963_s23 = smov 17   ;;  %v331_v6 = vld [vmem:[%s2776_s4] sm:$0xf]  ;;  %v332_v10 = vld [vmem:[%s2776_s4 + $0x4] sm:$0xf] }
  0x18   : > { %s1964_s26 = smov 16   ;;  %s1965_s11 = smov 15   ;;  %v333_v19 = vld [vmem:[%s2776_s4 + $0x8] sm:$0xf]  ;;  %v334_v24 = vld [vmem:[%s2776_s4 + $0xc] sm:$0xf] }
  0x19   : > { %s2072_s18 = scalar_select %p315_p10, %s2043_s7, 1  ;;  %v2089_v4 = vshrl.u32 %v2781_v0, 7  ;;  %v335_v29 = vld [vmem:[%s2776_s4 + $0x10] sm:$0xf]  ;;  %v2159_v34 = vld [vmem:[%s2776_s4 + $0x14] sm:$0xf] }
  0x1a   : > { %s1966_s20 = smov 1   ;;  %s1967_s27 = smov 127   ;;  %v2172_v38 = vld [vmem:[%s2776_s4 + $0x18] sm:$0xf]  ;;  %v2181_v41 = vld [vmem:[%s2776_s4 + $0x1c] sm:$0xf] }
  0x1b   : > { %s1833_s19 = sshll.u32 %s2072_s18, 4  ;;  %2793 = vst [vmem:[#allocation6_spill] sm:$0xff] %v2089_v4  ;;  %v2094_v5 = vsub.s32 0, %v2089_v4  ;;  %v2103_v8 = vsub.s32 1, %v2089_v4  ;;  %v2112_v13 = vsub.s32 2, %v2089_v4  ;;  %v2120_v15 = vsub.s32 3, %v2089_v4 }
  0x1c   : > { %s324_s22 = scalar_lea.vmem %s2773_s1, %s1833_s19  ;;  %s1968_s14 = smov 113   ;;  %v2194_v44 = vld [vmem:[%s2776_s4 + $0x20] sm:$0xf]  ;;  %v344_v47 = vand.u32 127, %v2781_v0  ;;  %vm427_vm0 = vcmask 138240   ;;  %vm635_vm3 = vcmask 121856  }
  0x1d   : > { %v2080_v1 = vld [vmem:[%s324_s22] sm:$0xff]  ;;  %v2082_v2 = vld [vmem:[%s324_s22 + $0x8] sm:$0xff]  ;;  %2794 = vst [vmem:[#allocation7_spill] sm:$0xff] %v2094_v5  ;;  %v441_v7 = vrot.slane %v331_v6, %v2094_v5  ;;  %2795 = vst [vmem:[#allocation8_spill] sm:$0xff] %v2103_v8  ;;  %v464_v9 = vrot.slane %v331_v6, %v2103_v8  ;;  %v542_v11 = vrot.slane %v332_v10, %v2094_v5  ;;  %s1969_s28 = smov 112   ;;  %s1970_s13 = smov 111  }
  0x1e   : > { %423 = vrot.lane.b32.xlu1 %v2080_v1, %s1963_s23  ;;  %v374_v3 = vadd.f32 %v2082_v2, %v2080_v1  ;;  %v565_v12 = vrot.slane %v332_v10, %v2103_v8  ;;  %v487_v14 = vrot.slane %v331_v6, %v2112_v13  ;;  %2796 = vst [vmem:[#allocation9_spill] sm:$0xff] %v2120_v15  ;;  %v2201_v48 = vadd.s32 128, %v344_v47  ;;  %s1701_s18 = sld [smem:[#allocation2]] }
  0x1f   : > { %v588_v16 = vrot.slane %v332_v10, %v2112_v13  ;;  %v510_v17 = vrot.slane %v331_v6, %v2120_v15  ;;  %v611_v18 = vrot.slane %v332_v10, %v2120_v15  ;;  %v649_v20 = vrot.slane %v333_v19, %v2094_v5 }
  0x20   : > { %375 = vadd.xlane.f32.xlu0 %v374_v3  ;;  %v672_v21 = vrot.slane %v333_v19, %v2103_v8  ;;  %v695_v22 = vrot.slane %v333_v19, %v2112_v13  ;;  %v718_v23 = vrot.slane %v333_v19, %v2120_v15  ;;  %v752_v25 = vrot.slane %v334_v24, %v2094_v5 }
  0x21   : > { %v775_v26 = vrot.slane %v334_v24, %v2103_v8  ;;  %v798_v27 = vrot.slane %v334_v24, %v2112_v13  ;;  %v821_v28 = vrot.slane %v334_v24, %v2120_v15  ;;  %v844_v30 = vrot.slane %v335_v29, %v2094_v5 }
  0x22   : > { %425 = vrot.lane.b32.xlu1 %v2082_v2, %s1963_s23  ;;  %v867_v31 = vrot.slane %v335_v29, %v2103_v8  ;;  %v890_v32 = vrot.slane %v335_v29, %v2112_v13  ;;  %v913_v33 = vrot.slane %v335_v29, %v2120_v15  ;;  %v947_v35 = vrot.slane %v2159_v34, %v2094_v5 }
  0x23   : > { %v970_v36 = vrot.slane %v2159_v34, %v2103_v8  ;;  %v993_v37 = vrot.slane %v2159_v34, %v2112_v13  ;;  %v1050_v39 = vrot.slane %v2172_v38, %v2094_v5  ;;  %v1096_v40 = vrot.slane %v2172_v38, %v2112_v13 }
  0x24   : > { %v1151_v42 = vrot.slane %v2181_v41, %v2094_v5  ;;  %v1197_v43 = vrot.slane %v2181_v41, %v2112_v13  ;;  %v1254_v45 = vrot.slane %v2194_v44, %v2094_v5  ;;  %v1300_v46 = vrot.slane %v2194_v44, %v2112_v13 }
  0x25   : > { %v350_v50 = vand.u32 15, %v344_v47  ;;  %v357_v51 = vand.u32 15, %v2201_v48  ;;  %v2231_v29 = vsub.s32 %v344_v47, %v2089_v4  ;;  %vm534_vm5 = vcmask 130048  }
  0x26   : > { %532 = vrot.lane.b32.xlu1 %v2082_v2, %s1964_s26  ;;  %vm389_vm6 = vcmask 60416   ;;  %vm742_vm8 = vcmask 7168   ;;  %vm937_vm9 = vcmask 1039360   ;;  %vm1143_vm10 = vcmask 916480  }
  0x27   : > { %vm2205_vm1 = vcmp.ge.s32.totalorder %v350_v50, 1  ;;  %vm2212_vm2 = vcmp.ge.s32.totalorder %v357_v51, 1  ;;  %vm2237_vm4 = vcmp.lt.s32.totalorder %v350_v50, 15  ;;  %vm2278_vm7 = vcmp.lt.s32.totalorder %v357_v51, 15 }
  0x28   : > { %vm1040_vm11 = vcmask 924672   ;;  %vm411_vm12 = vcmask 31744   ;;  %vm1244_vm13 = vcmask 908288   ;;  %vm1343_vm14 = vcmask 1040384  }
  0x29   : > { %vm1346_vm15 = vcmask 1041408  }
  0x2a   : > { %443 = vbcast.lane.b32.xlu1 %v441_v7, 256 }
  0x2e   : > { %466 = vbcast.lane.b32.xlu1 %v464_v9, 256 }
  0x32   : > { %544 = vbcast.lane.b32.xlu1 %v542_v11, 256 }
  0x36   : > { %567 = vbcast.lane.b32.xlu1 %v565_v12, 256  ;;  %530 = vrot.lane.b32.xlu0 %v2080_v1, %s1964_s26 }
  0x3a   : > { %631 = vrot.lane.b32.xlu1 %v2080_v1, %s1965_s11  ;;  %633 = vrot.lane.b32.xlu0 %v2082_v2, %s1965_s11 }
  0x3e   : > { %489 = vbcast.lane.b32.xlu1 %v487_v14, 256  ;;  %590 = vbcast.lane.b32.xlu0 %v588_v16, 256 }
  0x42   : > { %512 = vbcast.lane.b32.xlu1 %v510_v17, 256  ;;  %613 = vbcast.lane.b32.xlu0 %v611_v18, 256 }
  0x46   : > { %651 = vbcast.lane.b32.xlu1 %v649_v20, 256  ;;  %674 = vbcast.lane.b32.xlu0 %v672_v21, 256 }
  0x4a   : > { %738 = vrot.lane.b32.xlu1 %v2080_v1, %s1966_s20  ;;  %740 = vrot.lane.b32.xlu0 %v2082_v2, %s1966_s20 }
  0x4e   : > { %697 = vbcast.lane.b32.xlu1 %v695_v22, 256  ;;  %720 = vbcast.lane.b32.xlu0 %v718_v23, 256 }
  0x52   : > { %754 = vbcast.lane.b32.xlu1 %v752_v25, 256  ;;  %777 = vbcast.lane.b32.xlu0 %v775_v26, 256 }
  0x56   : > { %800 = vbcast.lane.b32.xlu1 %v798_v27, 256  ;;  %823 = vbcast.lane.b32.xlu0 %v821_v28, 256 }
  0x5a   : > { %846 = vbcast.lane.b32.xlu1 %v844_v30, 256  ;;  %869 = vbcast.lane.b32.xlu0 %v867_v31, 256 }
  0x5e   : > { %933 = vrot.lane.b32.xlu1 %v2080_v1, %s1967_s27  ;;  %935 = vrot.lane.b32.xlu0 %v2082_v2, %s1967_s27 }
  0x62   : > { %892 = vbcast.lane.b32.xlu1 %v890_v32, 256  ;;  %915 = vbcast.lane.b32.xlu0 %v913_v33, 256 }
  0x66   : > { %949 = vbcast.lane.b32.xlu1 %v947_v35, 256  ;;  %972 = vbcast.lane.b32.xlu0 %v970_v36, 256  ;;  %v2801_v35 = vmov 0  ;;  %v329_v36 = vld [vmem:[%s2774_s2] sm:$0xf] }
  0x67   : > { %v2802_v35 = vsel %vm2237_vm4, 4294967295, %v2801_v35 }
  0x68   : > { %2803 = vst [vmem:[#allocation10_spill] sm:$0xff] %v2802_v35 }
  0x6a   : > { %1036 = vrot.lane.b32.xlu1 %v2080_v1, %s1968_s14 }
  0x6e   : > { %995 = vbcast.lane.b32.xlu1 %v993_v37, 256  ;;  %v1016_v37 = vrot.slane %v2159_v34, %v2120_v15 }
  0x72   : > { %1052 = vbcast.lane.b32.xlu1 %v1050_v39, 256 }
  0x76   : > { %1098 = vbcast.lane.b32.xlu1 %v1096_v40, 256 }
  0x7a   : > { %1141 = vrot.lane.b32.xlu1 %v2082_v2, %s1969_s28 }
  0x7e   : > { %1153 = vbcast.lane.b32.xlu1 %v1151_v42, 256 }
  0x82   : > { %1240 = vrot.lane.b32.xlu1 %v2080_v1, %s1970_s13 }
  0x86   : > { %1199 = vbcast.lane.b32.xlu1 %v1197_v43, 256 }
  0x8a   : > { %1256 = vbcast.lane.b32.xlu1 %v1254_v45, 256  ;;  %v1073_v45 = vrot.slane %v2172_v38, %v2103_v8 }
  0x8e   : > { %1302 = vbcast.lane.b32.xlu1 %v1300_v46, 256 }
  0x90   : > { %v424_v49 = vpop.permute.xlu1 %423 }
  0x91   : > { %v431_v55 = vsel %vm427_vm0, 0.0, %v424_v49 }
  0x92   : > { %v2218_v58 = vsel %vm2205_vm1, %v431_v55, 0.0 }
  0x94   : > { %v426_v52 = vpop.permute.xlu1 %425 }
  0x95   : > { %v428_v53 = vsel %vm427_vm0, %v424_v49, %v426_v52 }
  0x96   : > { %v2222_v59 = vsel %vm2212_vm2, %v428_v53, 0.0 }
  0x98   : > { %v533_v57 = vpop.permute.xlu1 %532 }
  0x9c   : > { %v444_v60 = vpop.permute.xlu1 %443 }
  0x9d   : > { %v445_v61 = vmul.f32 %v444_v60, %v2218_v58  ;;  %v446_v62 = vmul.f32 %v444_v60, %v2222_v59 }
  0x9f   : > { %v447_v63 = vrot.slane %v445_v61, 4  ;;  %v453_v3 = vrot.slane %v446_v62, 4 }
  0xa0   : > { %v467_v6 = vpop.permute.xlu1 %466 }
  0xa1   : > { %v448_v7 = vadd.f32 %v447_v63, %v445_v61  ;;  %v454_v9 = vadd.f32 %v453_v3, %v446_v62  ;;  %v468_v10 = vmul.f32 %v467_v6, %v2218_v58  ;;  %v469_v11 = vmul.f32 %v467_v6, %v2222_v59 }
  0xa3   : > { %v470_v12 = vrot.slane %v468_v10, 4  ;;  %v476_v14 = vrot.slane %v469_v11, 4  ;;  %v449_v16 = vrot.slane %v448_v7, 2  ;;  %v455_v17 = vrot.slane %v454_v9, 2 }
  0xa4   : > { %v545_v18 = vpop.permute.xlu1 %544 }
  0xa5   : > { %v471_v19 = vadd.f32 %v470_v12, %v468_v10  ;;  %v477_v20 = vadd.f32 %v476_v14, %v469_v11  ;;  %v450_v21 = vadd.f32 %v449_v16, %v448_v7  ;;  %v456_v22 = vadd.f32 %v455_v17, %v454_v9 }
  0xa7   : > { %v472_v24 = vrot.slane %v471_v19, 2  ;;  %v478_v25 = vrot.slane %v477_v20, 2  ;;  %v451_v26 = vrot.slane %v450_v21, 1  ;;  %v457_v27 = vrot.slane %v456_v22, 1 }
  0xa8   : > { %v568_v23 = vpop.permute.xlu1 %567 }
  0xa9   : > { %v2233_v30 = vadd.f32 %v472_v24, %v471_v19  ;;  %v2235_v32 = vadd.f32 %v478_v25, %v477_v20  ;;  %v2246_v39 = vadd.f32 %v451_v26, %v450_v21  ;;  %v2248_v40 = vadd.f32 %v457_v27, %v456_v22 }
  0xaa   : > { %v2804_v22 = vmov 0 }
  0xab   : > { %v474_v46 = vrot.slane %v2233_v30, 1  ;;  %v480_v53 = vrot.slane %v2235_v32, 1  ;;  %v2805_v22 = vsel %vm2278_vm7, 4294967295, %v2804_v22 }
  0xac   : > { %v2228_v28 = vpop.permute.xlu1 %631  ;;  %2806 = vst [vmem:[#allocation11_spill] sm:$0xff] %v2805_v22 }
  0xad   : > { %v376_v31 = vpop.xlane.xlu0 %375  ;;  %v639_v47 = vsel %vm635_vm3, 0.0, %v2228_v28 }
  0xae   : > { %v377_v33 = vmul.f32 0.00390625, %v376_v31  ;;  %v2269_v7 = vsel %vm2237_vm4, %v639_v47, 0.0 }
  0xb0   : > { %v382_v42 = vrot.slane %v377_v33, %v2231_v29  ;;  %v490_v43 = vpop.permute.xlu1 %489 }
  0xb1   : > { %v491_v49 = vmul.f32 %v490_v43, %v2218_v58  ;;  %v492_v50 = vmul.f32 %v490_v43, %v2222_v59  ;;  %v531_v52 = vpop.permute.xlu0 %530 }
  0xb2   : > { %v2260_v55 = vsel %vm534_vm5, %v531_v52, %v533_v57  ;;  %v2263_v60 = vsel %vm534_vm5, 0.0, %v531_v52  ;;  %v388_v61 = vmul.f32 %v382_v42, %v329_v36 }
  0xb3   : > { %v493_v62 = vrot.slane %v491_v49, 4  ;;  %v499_v63 = vrot.slane %v492_v50, 4  ;;  %v546_v3 = vmul.f32 %v545_v18, %v2263_v60  ;;  %v547_v6 = vmul.f32 %v545_v18, %v2260_v55 }
  0xb4   : > { %v569_v9 = vmul.f32 %v568_v23, %v2263_v60  ;;  %v570_v10 = vmul.f32 %v568_v23, %v2260_v55  ;;  %v513_v57 = vpop.permute.xlu1 %512  ;;  %v390_v11 = vsel %vm389_vm6, %v388_v61, 0.0  ;;  %vm1349_vm6 = vcmask 1042432  }
  0xb5   : > { %v494_v12 = vadd.f32 %v493_v62, %v491_v49  ;;  %v500_v14 = vadd.f32 %v499_v63, %v492_v50  ;;  %v548_v16 = vrot.slane %v546_v3, 4  ;;  %v554_v17 = vrot.slane %v547_v6, 4  ;;  %391 = vadd.xlane.f32.xlu0 %v390_v11  ;;  %v634_v23 = vpop.permute.xlu0 %633 }
  0xb6   : > { %v571_v19 = vrot.slane %v569_v9, 4  ;;  %v577_v20 = vrot.slane %v570_v10, 4  ;;  %v514_v18 = vmul.f32 %v513_v57, %v2218_v58  ;;  %v515_v21 = vmul.f32 %v513_v57, %v2222_v59 }
  0xb7   : > { %v495_v24 = vrot.slane %v494_v12, 2  ;;  %v501_v25 = vrot.slane %v500_v14, 2  ;;  %v549_v26 = vadd.f32 %v548_v16, %v546_v3  ;;  %v555_v27 = vadd.f32 %v554_v17, %v547_v6 }
  0xb8   : > { %v572_v31 = vadd.f32 %v571_v19, %v569_v9  ;;  %v578_v33 = vadd.f32 %v577_v20, %v570_v10  ;;  %v516_v36 = vrot.slane %v514_v18, 4  ;;  %v522_v42 = vrot.slane %v515_v21, 4  ;;  %v652_v43 = vpop.permute.xlu1 %651 }
  0xb9   : > { %v496_v47 = vadd.f32 %v495_v24, %v494_v12  ;;  %v502_v58 = vadd.f32 %v501_v25, %v500_v14  ;;  %v550_v49 = vrot.slane %v549_v26, 2  ;;  %v556_v59 = vrot.slane %v555_v27, 2  ;;  %v591_v10 = vpop.permute.xlu0 %590 }
  0xba   : > { %v573_v50 = vrot.slane %v572_v31, 2  ;;  %v579_v48 = vrot.slane %v578_v33, 2  ;;  %v517_v51 = vadd.f32 %v516_v36, %v514_v18  ;;  %v523_v52 = vadd.f32 %v522_v42, %v515_v21 }
  0xbb   : > { %v497_v61 = vrot.slane %v496_v47, 1  ;;  %v503_v62 = vrot.slane %v502_v58, 1  ;;  %v551_v63 = vadd.f32 %v550_v49, %v549_v26  ;;  %v557_v57 = vadd.f32 %v556_v59, %v555_v27 }
  0xbc   : > { %v574_v11 = vadd.f32 %v573_v50, %v572_v31  ;;  %v580_v3 = vadd.f32 %v579_v48, %v578_v33  ;;  %v518_v6 = vrot.slane %v517_v51, 2  ;;  %v524_v9 = vrot.slane %v523_v52, 2  ;;  %v2288_v24 = vpop.permute.xlu1 %738 }
  0xbd   : > { %v2283_v16 = vadd.f32 %v474_v46, %v2233_v30  ;;  %v2286_v12 = vadd.f32 %v480_v53, %v2235_v32  ;;  %v552_v14 = vrot.slane %v551_v63, 1  ;;  %v558_v17 = vrot.slane %v557_v57, 1 }
  0xbe   : > { %v575_v19 = vrot.slane %v574_v11, 1  ;;  %v581_v20 = vrot.slane %v580_v3, 1  ;;  %v519_v18 = vadd.f32 %v518_v6, %v517_v51  ;;  %v525_v21 = vadd.f32 %v524_v9, %v523_v52 }
  0xbf   : > { %v553_v25 = vadd.f32 %v552_v14, %v551_v63  ;;  %v559_v26 = vadd.f32 %v558_v17, %v557_v57  ;;  %v636_v27 = vsel %vm635_vm3, %v2228_v28, %v634_v23  ;;  %v653_v31 = vmul.f32 %v652_v43, %v2269_v7 }
  0xc0   : > { %v2293_v30 = vadd.f32 %v497_v61, %v496_v47  ;;  %v2295_v46 = vadd.f32 %v503_v62, %v502_v58  ;;  %v520_v32 = vrot.slane %v519_v18, 1  ;;  %v526_v53 = vrot.slane %v525_v21, 1  ;;  %v614_v58 = vpop.permute.xlu0 %613  ;;  %v698_v63 = vpop.permute.xlu1 %697 }
  0xc1   : > { %v2299_v33 = vsel %vm2278_vm7, %v636_v27, 0.0  ;;  %v560_v36 = vadd.f32 %v553_v25, %v2246_v39  ;;  %v2303_v42 = vadd.f32 %v559_v26, %v2248_v40  ;;  %v655_v49 = vrot.slane %v653_v31, 4 }
  0xc2   : > { %v576_v59 = vadd.f32 %v575_v19, %v574_v11  ;;  %v2305_v28 = vadd.f32 %v581_v20, %v580_v3  ;;  %v654_v23 = vmul.f32 %v652_v43, %v2299_v33  ;;  %v592_v47 = vmul.f32 %v591_v10, %v2263_v60 }
  0xc3   : > { %v2309_v50 = vadd.f32 %v520_v32, %v519_v18  ;;  %v656_v48 = vadd.f32 %v655_v49, %v653_v31  ;;  %v593_v51 = vmul.f32 %v591_v10, %v2260_v55  ;;  %v615_v52 = vmul.f32 %v614_v58, %v2263_v60 }
  0xc4   : > { %v2313_v39 = vadd.f32 %v526_v53, %v525_v21  ;;  %v661_v40 = vrot.slane %v654_v23, 4  ;;  %v594_v61 = vrot.slane %v592_v47, 4  ;;  %v616_v62 = vmul.f32 %v614_v58, %v2260_v55  ;;  %v675_v53 = vpop.permute.xlu0 %674 }
  0xc5   : > { %v657_v57 = vrot.slane %v656_v48, 2  ;;  %v600_v11 = vrot.slane %v593_v51, 4  ;;  %v617_v43 = vrot.slane %v615_v52, 4  ;;  %v699_v3 = vmul.f32 %v698_v63, %v2269_v7 }
  0xc6   : > { %v662_v6 = vadd.f32 %v661_v40, %v654_v23  ;;  %v595_v9 = vadd.f32 %v594_v61, %v592_v47  ;;  %v623_v14 = vrot.slane %v616_v62, 4  ;;  %v700_v17 = vmul.f32 %v698_v63, %v2299_v33 }
  0xc7   : > { %v658_v10 = vadd.f32 %v657_v57, %v656_v48  ;;  %v601_v19 = vadd.f32 %v600_v11, %v593_v51  ;;  %v618_v60 = vadd.f32 %v617_v43, %v615_v52  ;;  %v701_v20 = vrot.slane %v699_v3, 4 }
  0xc8   : > { %v663_v18 = vrot.slane %v662_v6, 2  ;;  %v596_v21 = vrot.slane %v595_v9, 2  ;;  %v624_v25 = vadd.f32 %v623_v14, %v616_v62  ;;  %v707_v55 = vrot.slane %v700_v17, 4 }
  0xc9   : > { %v659_v26 = vrot.slane %v658_v10, 1  ;;  %v602_v27 = vrot.slane %v601_v19, 2  ;;  %v619_v31 = vrot.slane %v618_v60, 2  ;;  %v702_v32 = vadd.f32 %v701_v20, %v699_v3 }
  0xca   : > { %v664_v49 = vadd.f32 %v663_v18, %v662_v6  ;;  %v597_v23 = vadd.f32 %v596_v21, %v595_v9  ;;  %v625_v47 = vrot.slane %v624_v25, 2  ;;  %v708_v58 = vadd.f32 %v707_v55, %v700_v17  ;;  %v741_v55 = vpop.permute.xlu0 %740 }
  0xcb   : > { %v660_v40 = vadd.f32 %v659_v26, %v658_v10  ;;  %v603_v61 = vadd.f32 %v602_v27, %v601_v19  ;;  %v620_v48 = vadd.f32 %v619_v31, %v618_v60  ;;  %v703_v51 = vrot.slane %v702_v32, 2  ;;  %1038 = vrot.lane.b32.xlu0 %v2082_v2, %s1968_s14  ;;  %v2322_v10 = vpop.permute.xlu1 %754 }
  0xcc   : > { %v665_v52 = vrot.slane %v664_v49, 1  ;;  %v598_v63 = vrot.slane %v597_v23, 1  ;;  %v626_v62 = vadd.f32 %v625_v47, %v624_v25  ;;  %v709_v57 = vrot.slane %v708_v58, 2 }
  0xcd   : > { %v2320_v11 = vadd.f32 %v660_v40, %v560_v36  ;;  %v604_v43 = vrot.slane %v603_v61, 1  ;;  %v621_v3 = vrot.slane %v620_v48, 1  ;;  %v704_v14 = vadd.f32 %v703_v51, %v702_v32 }
  0xce   : > { %v666_v6 = vadd.f32 %v665_v52, %v664_v49  ;;  %v599_v9 = vadd.f32 %v598_v63, %v597_v23  ;;  %v627_v20 = vrot.slane %v626_v62, 1  ;;  %v710_v17 = vadd.f32 %v709_v57, %v708_v58  ;;  %v721_v58 = vpop.permute.xlu0 %720 }
  0xcf   : > { %v605_v19 = vadd.f32 %v604_v43, %v603_v61  ;;  %v622_v60 = vadd.f32 %v621_v3, %v620_v48  ;;  %v705_v18 = vrot.slane %v704_v14, 1  ;;  %v583_v21 = vadd.f32 %v576_v59, %v2283_v16  ;;  %1018 = vbcast.lane.b32.xlu0 %v1016_v37, 256 }
  0xd0   : > { %v2329_v36 = vadd.f32 %v666_v6, %v2303_v42  ;;  %v606_v25 = vadd.f32 %v599_v9, %v2293_v30  ;;  %v628_v26 = vadd.f32 %v627_v20, %v626_v62  ;;  %v711_v27 = vrot.slane %v710_v17, 1 }
  0xd1   : > { %v607_v31 = vadd.f32 %v605_v19, %v2295_v46  ;;  %v2334_v32 = vadd.f32 %v622_v60, %v2309_v50  ;;  %v706_v49 = vadd.f32 %v705_v18, %v704_v14  ;;  %v584_v16 = vadd.f32 %v2305_v28, %v2286_v12 }
  0xd2   : > { %v2339_v59 = vadd.f32 %v628_v26, %v2313_v39  ;;  %v712_v34 = vadd.f32 %v711_v27, %v710_v17  ;;  %v676_v37 = vmul.f32 %v675_v53, %v2269_v7  ;;  %v677_v42 = vmul.f32 %v675_v53, %v2299_v33  ;;  %v2352_v39 = vpop.permute.xlu1 %800 }
  0xd3   : > { %v2343_v30 = vadd.f32 %v706_v49, %v606_v25  ;;  %v743_v46 = vsel %vm742_vm8, %v2288_v24, %v741_v55  ;;  %1075 = vbcast.lane.b32.xlu0 %v1073_v45, 256  ;;  %v722_v48 = vmul.f32 %v721_v58, %v2269_v7  ;;  %v723_v51 = vmul.f32 %v721_v58, %v2299_v33 }
  0xd4   : > { %v714_v50 = vadd.f32 %v712_v34, %v607_v31  ;;  %v678_v23 = vrot.slane %v676_v37, 4  ;;  %v684_v12 = vrot.slane %v677_v42, 4  ;;  %v748_v28 = vsel %vm2212_vm2, %v743_v46, 0.0 }
  0xd5   : > { %v757_v47 = vmul.f32 %v2322_v10, %v748_v28  ;;  %v803_v53 = vmul.f32 %v2352_v39, %v748_v28  ;;  %v1119_v63 = vrot.slane %v2172_v38, %v2120_v15  ;;  %v724_v43 = vrot.slane %v722_v48, 4 }
  0xd6   : > { %v679_v40 = vadd.f32 %v678_v23, %v676_v37  ;;  %v685_v61 = vadd.f32 %v684_v12, %v677_v42  ;;  %v730_v3 = vrot.slane %v723_v51, 4  ;;  %v1174_v60 = vrot.slane %v2181_v41, %v2103_v8  ;;  %v778_v42 = vpop.permute.xlu0 %777 }
  0xd7   : > { %v764_v45 = vrot.slane %v757_v47, 4  ;;  %v810_v52 = vrot.slane %v803_v53, 4  ;;  %1139 = vrot.lane.b32.xlu0 %v2080_v1, %s1969_s28  ;;  %v725_v17 = vadd.f32 %v724_v43, %v722_v48 }
  0xd8   : > { %v680_v62 = vrot.slane %v679_v40, 2  ;;  %v686_v57 = vrot.slane %v685_v61, 2  ;;  %v731_v7 = vadd.f32 %v730_v3, %v723_v51 }
  0xd9   : > { %v765_v14 = vadd.f32 %v764_v45, %v757_v47  ;;  %v811_v6 = vadd.f32 %v810_v52, %v803_v53  ;;  %v726_v25 = vrot.slane %v725_v17, 2 }
  0xda   : > { %v681_v9 = vadd.f32 %v680_v62, %v679_v40  ;;  %v687_v20 = vadd.f32 %v686_v57, %v685_v61  ;;  %v732_v38 = vrot.slane %v731_v7, 2  ;;  %v824_v57 = vpop.permute.xlu0 %823 }
  0xdb   : > { %v766_v19 = vrot.slane %v765_v14, 2  ;;  %v812_v33 = vrot.slane %v811_v6, 2  ;;  %1121 = vbcast.lane.b32.xlu0 %v1119_v63, 256  ;;  %v727_v34 = vadd.f32 %v726_v25, %v725_v17  ;;  %v780_v63 = vmul.f32 %v778_v42, %v748_v28 }
  0xdc   : > { %v682_v18 = vrot.slane %v681_v9, 1  ;;  %v688_v55 = vrot.slane %v687_v20, 1  ;;  %v733_v37 = vadd.f32 %v732_v38, %v731_v7  ;;  %v826_v3 = vmul.f32 %v824_v57, %v748_v28  ;;  %v1827_v38 = vld [vmem:[%s2778_s6] ss:$0 sm:$0xff] }
  0xdd   : > { %v767_v26 = vadd.f32 %v766_v19, %v765_v14  ;;  %v813_v27 = vadd.f32 %v812_v33, %v811_v6  ;;  %v728_v53 = vrot.slane %v727_v34, 1  ;;  %v787_v43 = vrot.slane %v780_v63, 4 }
  0xde   : > { %v683_v31 = vadd.f32 %v682_v18, %v681_v9  ;;  %v689_v49 = vadd.f32 %v688_v55, %v687_v20  ;;  %v734_v58 = vrot.slane %v733_v37, 1  ;;  %v833_v14 = vrot.slane %v826_v3, 4  ;;  %v847_v18 = vpop.permute.xlu1 %846 }
  0xdf   : > { %v768_v46 = vrot.slane %v767_v26, 1  ;;  %v814_v23 = vrot.slane %v813_v27, 1  ;;  %1176 = vbcast.lane.b32.xlu0 %v1174_v60, 256  ;;  %v729_v48 = vadd.f32 %v728_v53, %v727_v34 }
  0xe0   : > { %v2364_v12 = vadd.f32 %v683_v31, %v583_v21  ;;  %v691_v47 = vadd.f32 %v689_v49, %v584_v16  ;;  %v735_v51 = vadd.f32 %v734_v58, %v733_v37  ;;  %v1220_v21 = vrot.slane %v2181_v41, %v2120_v15  ;;  %v870_v37 = vpop.permute.xlu0 %869 }
  0xe1   : > { %v769_v40 = vadd.f32 %v768_v46, %v767_v26  ;;  %v815_v61 = vadd.f32 %v814_v23, %v813_v27  ;;  %v2376_v16 = vadd.f32 %v729_v48, %v2334_v32  ;;  %v834_v9 = vadd.f32 %v833_v14, %v826_v3 }
  0xe2   : > { %v737_v62 = vadd.f32 %v735_v51, %v2339_v59  ;;  %v1323_v41 = vrot.slane %v2194_v44, %v2120_v15  ;;  %v934_v55 = vpop.permute.xlu1 %933  ;;  %v848_v58 = vmul.f32 %v847_v18, %v2080_v1 }
  0xe3   : > { %v2366_v45 = vadd.f32 %v815_v61, %v714_v50  ;;  %v2369_v52 = vadd.f32 %v769_v40, %v2329_v36  ;;  %1242 = vrot.lane.b32.xlu0 %v2082_v2, %s1970_s13  ;;  %v788_v50 = vadd.f32 %v787_v43, %v780_v63  ;;  %v1277_v36 = vrot.slane %v2194_v44, %v2103_v8 }
  0xe4   : > { %v835_v17 = vrot.slane %v834_v9, 2  ;;  %v746_v44 = vsel %vm742_vm8, 0.0, %v2288_v24  ;;  %v849_v40 = vmul.f32 %v847_v18, %v2082_v2  ;;  %v936_v48 = vpop.permute.xlu0 %935  ;;  %v850_v63 = vrot.slane %v848_v58, 4 }
  0xe5   : > { %v789_v6 = vrot.slane %v788_v50, 2  ;;  %v747_v31 = vsel %vm2205_vm1, %v746_v44, 0.0  ;;  %v941_v14 = vsel %vm937_vm9, %v936_v48, 0.0 }
  0xe6   : > { %v836_v7 = vadd.f32 %v835_v17, %v834_v9  ;;  %v893_v25 = vpop.permute.xlu1 %892  ;;  %v756_v49 = vmul.f32 %v2322_v10, %v747_v31  ;;  %v802_v34 = vmul.f32 %v2352_v39, %v747_v31  ;;  %v779_v24 = vmul.f32 %v778_v42, %v747_v31 }
  0xe7   : > { %1222 = vbcast.lane.b32.xlu0 %v1220_v21, 256  ;;  %v790_v20 = vadd.f32 %v789_v6, %v788_v50  ;;  %v856_v21 = vrot.slane %v849_v40, 4  ;;  %v825_v3 = vmul.f32 %v824_v57, %v747_v31  ;;  %v938_v50 = vsel %vm937_vm9, %v934_v55, %v936_v48 }
  0xe8   : > { %v837_v19 = vrot.slane %v836_v7, 1  ;;  %v758_v23 = vrot.slane %v756_v49, 4  ;;  %v781_v10 = vrot.slane %v779_v24, 4  ;;  %v916_v6 = vpop.permute.xlu0 %915  ;;  %v851_v42 = vadd.f32 %v850_v63, %v848_v58 }
  0xe9   : > { %v791_v32 = vrot.slane %v790_v20, 1  ;;  %v857_v9 = vadd.f32 %v856_v21, %v849_v40  ;;  %v895_v17 = vmul.f32 %v893_v25, %v2082_v2  ;;  %v2416_v57 = vsel %vm2278_vm7, %v941_v14, 0.0 }
  0xea   : > { %v838_v33 = vadd.f32 %v837_v19, %v836_v7  ;;  %v950_v26 = vpop.permute.xlu1 %949  ;;  %v759_v61 = vadd.f32 %v758_v23, %v756_v49  ;;  %v2412_v7 = vsel %vm2237_vm4, %v938_v50, 0.0  ;;  %v917_v18 = vmul.f32 %v916_v6, %v2080_v1 }
  0xeb   : > { %1279 = vbcast.lane.b32.xlu0 %v1277_v36, 256  ;;  %v792_v59 = vadd.f32 %v791_v32, %v790_v20  ;;  %v894_v36 = vmul.f32 %v893_v25, %v2080_v1  ;;  %v782_v20 = vadd.f32 %v781_v10, %v779_v24  ;;  %v872_v32 = vmul.f32 %v870_v37, %v2082_v2 }
  0xec   : > { %v2385_v60 = vadd.f32 %v838_v33, %v737_v62  ;;  %v760_v62 = vrot.slane %v759_v61, 2  ;;  %v827_v33 = vrot.slane %v825_v3, 4  ;;  %v918_v25 = vmul.f32 %v916_v6, %v2082_v2 }
  0xed   : > { %v2383_v28 = vadd.f32 %v792_v59, %v691_v47  ;;  %v804_v47 = vrot.slane %v802_v34, 4  ;;  %v896_v55 = vrot.slane %v894_v36, 4  ;;  %v852_v44 = vrot.slane %v851_v42, 2 }
  0xee   : > { %v2392_v27 = vpop.permute.xlu1 %1036  ;;  %v761_v59 = vadd.f32 %v760_v62, %v759_v61  ;;  %v858_v31 = vrot.slane %v857_v9, 2  ;;  %v951_v49 = vmul.f32 %v950_v26, %v2412_v7  ;;  %v902_v23 = vrot.slane %v895_v17, 4 }
  0xef   : > { %1325 = vbcast.lane.b32.xlu0 %v1323_v41, 256  ;;  %v805_v51 = vadd.f32 %v804_v47, %v802_v34  ;;  %v871_v41 = vmul.f32 %v870_v37, %v2080_v1  ;;  %v952_v34 = vmul.f32 %v950_v26, %v2416_v57  ;;  %v783_v37 = vrot.slane %v782_v20, 2 }
  0xf0   : > { %v879_v58 = vrot.slane %v872_v32, 4  ;;  %v762_v40 = vrot.slane %v761_v59, 1  ;;  %v828_v61 = vadd.f32 %v827_v33, %v825_v3  ;;  %v919_v48 = vrot.slane %v917_v18, 4 }
  0xf1   : > { %v806_v43 = vrot.slane %v805_v51, 2  ;;  %v873_v47 = vrot.slane %v871_v41, 4  ;;  %v897_v1 = vadd.f32 %v896_v55, %v894_v36  ;;  %v853_v21 = vadd.f32 %v852_v44, %v851_v42 }
  0xf2   : > { %v996_v46 = vpop.permute.xlu1 %995  ;;  %v859_v10 = vadd.f32 %v858_v31, %v857_v9  ;;  %v953_v62 = vrot.slane %v951_v49, 4  ;;  %v784_v50 = vadd.f32 %v783_v37, %v782_v20  ;;  %v903_v26 = vadd.f32 %v902_v23, %v895_v17 }
  0xf3   : > { %1676 = vbcast.lane.b32.xlu0 %v1827_v38, 256  ;;  %v807_v19 = vadd.f32 %v806_v43, %v805_v51  ;;  %v925_v51 = vrot.slane %v918_v25, 4  ;;  %v997_v2 = vmul.f32 %v996_v46, %v2412_v7  ;;  %v998_v63 = vmul.f32 %v996_v46, %v2416_v57 }
  0xf4   : > { %v959_v43 = vrot.slane %v952_v34, 4  ;;  %v874_v14 = vadd.f32 %v873_v47, %v871_v41  ;;  %v880_v6 = vadd.f32 %v879_v58, %v872_v32  ;;  %v763_v15 = vadd.f32 %v762_v40, %v761_v59  ;;  %v973_v58 = vpop.permute.xlu0 %972 }
  0xf5   : > { %v808_v24 = vrot.slane %v807_v19, 1  ;;  %v829_v3 = vrot.slane %v828_v61, 2  ;;  %v920_v33 = vadd.f32 %v919_v48, %v917_v18  ;;  %v898_v36 = vrot.slane %v897_v1, 2 }
  0xf6   : > { %v2398_v53 = vpop.permute.xlu1 %1052  ;;  %v926_v55 = vadd.f32 %v925_v51, %v918_v25  ;;  %v999_v5 = vrot.slane %v997_v2, 4  ;;  %v1005_v4 = vrot.slane %v998_v63, 4  ;;  %v854_v46 = vrot.slane %v853_v21, 1 }
  0xf7   : > { %v809_v8 = vadd.f32 %v808_v24, %v807_v19  ;;  %v860_v42 = vrot.slane %v859_v10, 1  ;;  %v954_v9 = vadd.f32 %v953_v62, %v951_v49  ;;  %v960_v44 = vadd.f32 %v959_v43, %v952_v34 }
  0xf8   : > { %v785_v31 = vrot.slane %v784_v50, 1  ;;  %v904_v20 = vrot.slane %v903_v26, 2  ;;  %v875_v17 = vrot.slane %v874_v14, 2  ;;  %v881_v41 = vrot.slane %v880_v6, 2 }
  0xf9   : > { %v770_v32 = vadd.f32 %v763_v15, %v2320_v11  ;;  %v816_v59 = vadd.f32 %v809_v8, %v2343_v30  ;;  %v830_v19 = vadd.f32 %v829_v3, %v828_v61  ;;  %v921_v37 = vrot.slane %v920_v33, 2 }
  0xfa   : > { %v2402_v39 = vpop.permute.xlu1 %1098  ;;  %v899_v18 = vadd.f32 %v898_v36, %v897_v1  ;;  %v927_v23 = vrot.slane %v926_v55, 2  ;;  %v1000_v47 = vadd.f32 %v999_v5, %v997_v2  ;;  %v1006_v25 = vadd.f32 %v1005_v4, %v998_v63 }
  0xfb   : > { %v855_v24 = vadd.f32 %v854_v46, %v853_v21  ;;  %v861_v49 = vadd.f32 %v860_v42, %v859_v10  ;;  %v955_v34 = vrot.slane %v954_v9, 2  ;;  %v961_v48 = vrot.slane %v960_v44, 2 }
  0xfc   : > { %v786_v51 = vadd.f32 %v785_v31, %v784_v50  ;;  %v905_v62 = vadd.f32 %v904_v20, %v903_v26  ;;  %v876_v43 = vadd.f32 %v875_v17, %v874_v14  ;;  %v882_v22 = vadd.f32 %v881_v41, %v880_v6 }
  0xfd   : > { %v831_v15 = vrot.slane %v830_v19, 1  ;;  %v922_v11 = vadd.f32 %v921_v37, %v920_v33  ;;  %v974_v8 = vmul.f32 %v973_v58, %v2412_v7  ;;  %v975_v30 = vmul.f32 %v973_v58, %v2416_v57 }
  0xfe   : > { %v2420_v38 = vpop.permute.xlu1 %1141  ;;  %v900_v61 = vrot.slane %v899_v18, 1  ;;  %v928_v5 = vadd.f32 %v927_v23, %v926_v55  ;;  %v1001_v4 = vrot.slane %v1000_v47, 2  ;;  %v1007_v1 = vrot.slane %v1006_v25, 2 }
  0xff   : > { %v862_v2 = vadd.f32 %v855_v24, %v770_v32  ;;  %v863_v63 = vadd.f32 %v861_v49, %v2369_v52  ;;  %v956_v21 = vadd.f32 %v955_v34, %v954_v9  ;;  %v962_v10 = vadd.f32 %v961_v48, %v960_v44 }
 0x100   : > { %v906_v3 = vrot.slane %v905_v62, 1  ;;  %v877_v50 = vrot.slane %v876_v43, 1  ;;  %v883_v26 = vrot.slane %v882_v22, 1  ;;  %v2437_v14 = vsel %vm1143_vm10, %v2420_v38, 0.0 }
 0x101   : > { %v832_v33 = vadd.f32 %v831_v15, %v830_v19  ;;  %v923_v36 = vrot.slane %v922_v11, 1  ;;  %v976_v46 = vrot.slane %v974_v8, 4  ;;  %v982_v55 = vrot.slane %v975_v30, 4 }
 0x102   : > { %v2426_v0 = vpop.permute.xlu1 %1153  ;;  %v901_v42 = vadd.f32 %v900_v61, %v899_v18  ;;  %v929_v31 = vrot.slane %v928_v5, 1  ;;  %v1002_v20 = vadd.f32 %v1001_v4, %v1000_v47  ;;  %v1008_v17 = vadd.f32 %v1007_v1, %v1006_v25 }
 0x103   : > { %v957_v52 = vrot.slane %v956_v21, 1  ;;  %v963_v9 = vrot.slane %v962_v10, 1  ;;  %v1156_v44 = vmul.f32 %v2426_v0, %v2437_v14  ;;  %v793_v32 = vadd.f32 %v786_v51, %v2364_v12 }
 0x104   : > { %v907_v37 = vadd.f32 %v906_v3, %v905_v62  ;;  %v878_v23 = vadd.f32 %v877_v50, %v876_v43  ;;  %v884_v19 = vadd.f32 %v883_v26, %v882_v22  ;;  %v839_v58 = vadd.f32 %v832_v33, %v2376_v16  ;;  %v330_v43 = vld [vmem:[%s2775_s3] sm:$0xff] }
 0x105   : > { %v924_v24 = vadd.f32 %v923_v36, %v922_v11  ;;  %v977_v18 = vadd.f32 %v976_v46, %v974_v8  ;;  %v983_v49 = vadd.f32 %v982_v55, %v975_v30  ;;  %v908_v47 = vadd.f32 %v901_v42, %v816_v59 }
 0x106   : > { %v2430_v40 = vpop.permute.xlu1 %1240  ;;  %v930_v25 = vadd.f32 %v929_v31, %v928_v5  ;;  %v1003_v34 = vrot.slane %v1002_v20, 1  ;;  %v1009_v48 = vrot.slane %v1008_v17, 1  ;;  %v958_v15 = vadd.f32 %v957_v52, %v956_v21 }
 0x107   : > { %2807 = vst [vmem:[#allocation12_spill] sm:$0xff] %v2430_v40  ;;  %v964_v61 = vadd.f32 %v963_v9, %v962_v10  ;;  %v1163_v4 = vrot.slane %v1156_v44, 4  ;;  %v2448_v40 = vadd.f32 %v907_v37, %v2366_v45  ;;  %v2450_v12 = vadd.f32 %v878_v23, %v793_v32 }
 0x108   : > { %v2453_v22 = vadd.f32 %v884_v19, %v2383_v28  ;;  %v2455_v51 = vadd.f32 %v924_v24, %v839_v58  ;;  %v978_v59 = vrot.slane %v977_v18, 2  ;;  %v984_v62 = vrot.slane %v983_v49, 2 }
 0x109   : > { %v2461_v11 = vadd.f32 %v930_v25, %v2385_v60  ;;  %v1004_v45 = vadd.f32 %v1003_v34, %v1002_v20  ;;  %v2463_v8 = vadd.f32 %v1009_v48, %v1008_v17  ;;  %v2466_v28 = vadd.f32 %v958_v15, %v862_v2 }
 0x10a   : > { %v2439_v6 = vpop.permute.xlu1 %1199  ;;  %v2468_v5 = vadd.f32 %v964_v61, %v863_v63  ;;  %v1164_v21 = vadd.f32 %v1163_v4, %v1156_v44  ;;  %v979_v60 = vadd.f32 %v978_v59, %v977_v18  ;;  %v985_v36 = vadd.f32 %v984_v62, %v983_v49 }
 0x10b   : > { %v1202_v41 = vmul.f32 %v2439_v6, %v2437_v14  ;;  %v2489_v55 = vadd.f32 %v1004_v45, %v908_v47 }
 0x10c   : > { %v1165_v42 = vrot.slane %v1164_v21, 2  ;;  %v980_v32 = vrot.slane %v979_v60, 1  ;;  %v986_v37 = vrot.slane %v985_v36, 1 }
 0x10d   : > { %v1209_v35 = vrot.slane %v1202_v41, 4 }
 0x10e   : > { %v1166_v18 = vadd.f32 %v1165_v42, %v1164_v21 }
 0x10f   : > { %v1210_v3 = vadd.f32 %v1209_v35, %v1202_v41 }
 0x111   : > { %v1211_v31 = vrot.slane %v1210_v3, 2 }
 0x113   : > { %v1212_v49 = vadd.f32 %v1211_v31, %v1210_v3 }
 0x142   : > { %v392_v1 = vpop.xlane.xlu0 %391 }
 0x143   : > { %v393_v16 = vmax.f32 %v392_v1, 0.0 }
 0x145   : > { %v398_v30 = vrot.slane %v393_v16, %v2231_v29 }
 0x146   : > { %v1039_v10 = vpop.permute.xlu0 %1038 }
 0x147   : > { %v1041_v50 = vsel %vm1040_vm11, %v2392_v27, %v1039_v10  ;;  %v1044_v26 = vsel %vm1040_vm11, %v1039_v10, 0.0  ;;  %v410_v33 = vmul.f32 %v398_v30, %v330_v43 }
 0x148   : > { %v2475_v46 = vsel %vm2205_vm1, %v1041_v50, 0.0  ;;  %v2479_v29 = vsel %vm2212_vm2, %v1044_v26, 0.0  ;;  %v2498_v26 = vld [vmem:[%s2777_s5] sm:$0xff] }
 0x149   : > { %v1054_v35 = vmul.f32 %v2398_v53, %v2475_v46  ;;  %v1055_v27 = vmul.f32 %v2398_v53, %v2479_v29  ;;  %v1100_v2 = vmul.f32 %v2402_v39, %v2475_v46  ;;  %v1101_v63 = vmul.f32 %v2402_v39, %v2479_v29 }
 0x14a   : > { %v412_v20 = vsel %vm411_vm12, %v410_v33, 0.0  ;;  %v1019_v17 = vpop.permute.xlu0 %1018  ;;  %v987_v33 = vadd.f32 %v986_v37, %v985_v36  ;;  %vm1375_vm12 = vcmask 1043456  }
 0x14b   : > { %v1056_v52 = vrot.slane %v1054_v35, 4  ;;  %v1062_v9 = vrot.slane %v1055_v27, 4  ;;  %v1102_v44 = vrot.slane %v1100_v2, 4  ;;  %v1108_v41 = vrot.slane %v1101_v63, 4  ;;  %413 = vadd.xlane.f32.xlu1 %v412_v20 }
 0x14c   : > { %v1020_v53 = vmul.f32 %v1019_v17, %v2412_v7  ;;  %v1021_v23 = vmul.f32 %v1019_v17, %v2416_v57  ;;  %v981_v57 = vadd.f32 %v980_v32, %v979_v60  ;;  %v1012_v20 = vadd.f32 %v2463_v8, %v2448_v40 }
 0x14d   : > { %v1057_v19 = vadd.f32 %v1056_v52, %v1054_v35  ;;  %v1063_v58 = vadd.f32 %v1062_v9, %v1055_v27  ;;  %v1103_v39 = vadd.f32 %v1102_v44, %v1100_v2  ;;  %v1109_v24 = vadd.f32 %v1108_v41, %v1101_v63 }
 0x14e   : > { %v1022_v47 = vrot.slane %v1020_v53, 4  ;;  %v1028_v25 = vrot.slane %v1021_v23, 4  ;;  %v1076_v34 = vpop.permute.xlu0 %1075  ;;  %v1167_v35 = vrot.slane %v1166_v18, 1  ;;  %v1213_v27 = vrot.slane %v1212_v49, 1 }
 0x14f   : > { %v1058_v48 = vrot.slane %v1057_v19, 2  ;;  %v1064_v15 = vrot.slane %v1063_v58, 2  ;;  %v1104_v61 = vrot.slane %v1103_v39, 2  ;;  %v1110_v4 = vrot.slane %v1109_v24, 2 }
 0x150   : > { %v1023_v1 = vadd.f32 %v1022_v47, %v1020_v53  ;;  %v1029_v16 = vadd.f32 %v1028_v25, %v1021_v23  ;;  %v1077_v59 = vmul.f32 %v1076_v34, %v2475_v46  ;;  %v1078_v7 = vmul.f32 %v1076_v34, %v2479_v29 }
 0x151   : > { %v1059_v62 = vadd.f32 %v1058_v48, %v1057_v19  ;;  %v1065_v43 = vadd.f32 %v1064_v15, %v1063_v58  ;;  %v1105_v45 = vadd.f32 %v1104_v61, %v1103_v39  ;;  %v1111_v30 = vadd.f32 %v1110_v4, %v1109_v24 }
 0x152   : > { %v1024_v21 = vrot.slane %v1023_v1, 2  ;;  %v1079_v10 = vrot.slane %v1077_v59, 4  ;;  %v1085_v3 = vrot.slane %v1078_v7, 4  ;;  %v1140_v50 = vpop.permute.xlu0 %1139  ;;  %v1030_v2 = vrot.slane %v1029_v16, 2 }
 0x153   : > { %v1060_v63 = vrot.slane %v1059_v62, 1  ;;  %v1066_v42 = vrot.slane %v1065_v43, 1  ;;  %v1106_v17 = vrot.slane %v1105_v45, 1  ;;  %v1438_v52 = vrot.slane %v2498_v26, %v2112_v13 }
 0x154   : > { %v1080_v60 = vadd.f32 %v1079_v10, %v1077_v59  ;;  %v1086_v31 = vadd.f32 %v1085_v3, %v1078_v7  ;;  %v1112_v9 = vrot.slane %v1111_v30, 1  ;;  %v1025_v44 = vadd.f32 %v1024_v21, %v1023_v1 }
 0x155   : > { %v2505_v37 = vadd.f32 %v981_v57, %v2450_v12  ;;  %v2508_v53 = vadd.f32 %v987_v33, %v2453_v22  ;;  %v2510_v23 = vadd.f32 %v1167_v35, %v1166_v18  ;;  %v2514_v40 = vsel %vm1143_vm10, %v1140_v50, %v2420_v38  ;;  %v1257_v35 = vpop.permute.xlu1 %1256 }
 0x156   : > { %v1081_v41 = vrot.slane %v1080_v60, 2  ;;  %v1087_v32 = vrot.slane %v1086_v31, 2  ;;  %v1122_v36 = vpop.permute.xlu0 %1121  ;;  %v1061_v8 = vadd.f32 %v1060_v63, %v1059_v62  ;;  %v1067_v19 = vadd.f32 %v1066_v42, %v1065_v43 }
 0x157   : > { %v1214_v13 = vadd.f32 %v1213_v27, %v1212_v49  ;;  %v1031_v58 = vadd.f32 %v1030_v2, %v1029_v16  ;;  %v2516_v39 = vadd.f32 %v1106_v17, %v1105_v45  ;;  %v1155_v24 = vmul.f32 %v2426_v0, %v2514_v40  ;;  %v2808_v27 = vld [vmem:[#allocation12_spill] sm:$0xff] }
 0x158   : > { %v1201_v12 = vmul.f32 %v2439_v6, %v2514_v40  ;;  %v1123_v22 = vmul.f32 %v1122_v36, %v2475_v46  ;;  %v1113_v18 = vadd.f32 %v1112_v9, %v1111_v30  ;;  %v1026_v47 = vrot.slane %v1025_v44, 1 }
 0x159   : > { %v1082_v25 = vadd.f32 %v1081_v41, %v1080_v60  ;;  %v1088_v34 = vadd.f32 %v1087_v32, %v1086_v31  ;;  %v1157_v48 = vrot.slane %v1155_v24, 4  ;;  %v1124_v49 = vmul.f32 %v1122_v36, %v2479_v29 }
 0x15a   : > { %v1177_v38 = vpop.permute.xlu0 %1176  ;;  %v1203_v15 = vrot.slane %v1201_v12, 4  ;;  %v1125_v61 = vrot.slane %v1123_v22, 4  ;;  %v2525_v4 = vadd.f32 %v1061_v8, %v2466_v28  ;;  %v1032_v1 = vrot.slane %v1031_v58, 1 }
 0x15b   : > { %v1178_v0 = vmul.f32 %v1177_v38, %v2514_v40  ;;  %v1179_v6 = vmul.f32 %v1177_v38, %v2437_v14  ;;  %v1158_v46 = vadd.f32 %v1157_v48, %v1155_v24  ;;  %v1131_v7 = vrot.slane %v1124_v49, 4 }
 0x15c   : > { %1440 = vbcast.lane.b32.xlu1 %v1438_v52, 256  ;;  %v1204_v16 = vadd.f32 %v1203_v15, %v1201_v12  ;;  %v1126_v59 = vadd.f32 %v1125_v61, %v1123_v22  ;;  %v1083_v57 = vrot.slane %v1082_v25, 1  ;;  %v1089_v62 = vrot.slane %v1088_v34, 1 }
 0x15d   : > { %v1180_v43 = vrot.slane %v1178_v0, 4  ;;  %v1186_v45 = vrot.slane %v1179_v6, 4  ;;  %v1159_v29 = vrot.slane %v1158_v46, 2  ;;  %v1132_v28 = vadd.f32 %v1131_v7, %v1124_v49 }
 0x15e   : > { %v1243_v30 = vpop.permute.xlu0 %1242  ;;  %v1205_v21 = vrot.slane %v1204_v16, 2  ;;  %v1127_v10 = vrot.slane %v1126_v59, 2  ;;  %v1115_v3 = vadd.f32 %v1113_v18, %v1012_v20  ;;  %v1069_v20 = vadd.f32 %v1067_v19, %v2468_v5 }
 0x15f   : > { %v1181_v50 = vadd.f32 %v1180_v43, %v1178_v0  ;;  %v1187_v33 = vadd.f32 %v1186_v45, %v1179_v6  ;;  %v1245_v2 = vsel %vm1244_vm13, %v2808_v27, %v1243_v30  ;;  %v1160_v63 = vadd.f32 %v1159_v29, %v1158_v46 }
 0x160   : > { %v1206_v42 = vadd.f32 %v1205_v21, %v1204_v16  ;;  %v1128_v60 = vadd.f32 %v1127_v10, %v1126_v59  ;;  %v1133_v31 = vrot.slane %v1132_v28, 2  ;;  %v1248_v9 = vsel %vm1244_vm13, %v1243_v30, 0.0 }
 0x161   : > { %v1182_v17 = vrot.slane %v1181_v50, 2  ;;  %v1188_v52 = vrot.slane %v1187_v33, 2  ;;  %v2534_v32 = vsel %vm2237_vm4, %v1245_v2, 0.0  ;;  %v1027_v36 = vadd.f32 %v1026_v47, %v1025_v44  ;;  %v1303_v47 = vpop.permute.xlu1 %1302 }
 0x162   : > { %v1084_v8 = vadd.f32 %v1083_v57, %v1082_v25  ;;  %v1090_v24 = vadd.f32 %v1089_v62, %v1088_v34  ;;  %v1223_v12 = vpop.permute.xlu0 %1222  ;;  %v1161_v22 = vrot.slane %v1160_v63, 1  ;;  %v1207_v18 = vrot.slane %v1206_v42, 1 }
 0x163   : > { %v2539_v48 = vsel %vm2278_vm7, %v1248_v9, 0.0  ;;  %v1258_v15 = vmul.f32 %v1257_v35, %v2534_v32  ;;  %v2542_v49 = vadd.f32 %v1214_v13, %v1115_v3  ;;  %v2544_v61 = vadd.f32 %v1032_v1, %v1031_v58 }
 0x164   : > { %v1129_v0 = vrot.slane %v1128_v60, 1  ;;  %v1134_v6 = vadd.f32 %v1133_v31, %v1132_v28  ;;  %v1183_v46 = vadd.f32 %v1182_v17, %v1181_v50  ;;  %v1189_v5 = vadd.f32 %v1188_v52, %v1187_v33 }
 0x165   : > { %v1259_v44 = vmul.f32 %v1257_v35, %v2539_v48  ;;  %v1260_v19 = vrot.slane %v1258_v15, 4  ;;  %v2548_v25 = vadd.f32 %v1027_v36, %v2455_v51  ;;  %v1091_v34 = vadd.f32 %v1084_v8, %v2505_v37 }
 0x166   : > { %v2552_v16 = vadd.f32 %v1090_v24, %v2508_v53  ;;  %v2555_v13 = vadd.f32 %v2510_v23, %v1069_v20  ;;  %v1162_v58 = vadd.f32 %v1161_v22, %v1160_v63  ;;  %v2557_v1 = vadd.f32 %v1207_v18, %v1206_v42  ;;  %v1280_v45 = vpop.permute.xlu0 %1279 }
 0x167   : > { %v1261_v59 = vadd.f32 %v1260_v19, %v1258_v15  ;;  %v1266_v7 = vrot.slane %v1259_v44, 4  ;;  %v2559_v57 = vadd.f32 %v1129_v0, %v1128_v60  ;;  %v1135_v62 = vrot.slane %v1134_v6, 1 }
 0x168   : > { %v1304_v43 = vmul.f32 %v1303_v47, %v2534_v32  ;;  %v1305_v51 = vmul.f32 %v1303_v47, %v2539_v48  ;;  %v1184_v37 = vrot.slane %v1183_v46, 1  ;;  %v1190_v30 = vrot.slane %v1189_v5, 1 }
 0x169   : > { %v1262_v53 = vrot.slane %v1261_v59, 2  ;;  %v1267_v29 = vadd.f32 %v1266_v7, %v1259_v44  ;;  %v1224_v10 = vmul.f32 %v1223_v12, %v2514_v40  ;;  %v1225_v28 = vmul.f32 %v1223_v12, %v2437_v14 }
 0x16a   : > { %v1306_v21 = vrot.slane %v1304_v43, 4  ;;  %v1312_v23 = vrot.slane %v1305_v51, 4  ;;  %v1281_v33 = vmul.f32 %v1280_v45, %v2534_v32  ;;  %v1282_v35 = vmul.f32 %v1280_v45, %v2539_v48  ;;  %v1326_v44 = vpop.permute.xlu0 %1325 }
 0x16b   : > { %v1263_v3 = vadd.f32 %v1262_v53, %v1261_v59  ;;  %v1268_v50 = vrot.slane %v1267_v29, 2  ;;  %v1226_v63 = vrot.slane %v1224_v10, 4  ;;  %v1232_v42 = vrot.slane %v1225_v28, 4 }
 0x16c   : > { %v1307_v27 = vadd.f32 %v1306_v21, %v1304_v43  ;;  %v1313_v2 = vadd.f32 %v1312_v23, %v1305_v51  ;;  %v1185_v60 = vadd.f32 %v1184_v37, %v1183_v46  ;;  %v1283_v17 = vrot.slane %v1281_v33, 4 }
 0x16d   : > { %v1269_v31 = vadd.f32 %v1268_v50, %v1267_v29  ;;  %v1289_v52 = vrot.slane %v1282_v35, 4  ;;  %v1227_v36 = vadd.f32 %v1226_v63, %v1224_v10  ;;  %v1233_v40 = vadd.f32 %v1232_v42, %v1225_v28 }
 0x16e   : > { %v1308_v9 = vrot.slane %v1307_v27, 2  ;;  %v1314_v20 = vrot.slane %v1313_v2, 2  ;;  %v1264_v8 = vrot.slane %v1263_v3, 1  ;;  %v1284_v24 = vadd.f32 %v1283_v17, %v1281_v33 }
 0x16f   : > { %v1270_v14 = vrot.slane %v1269_v31, 1  ;;  %v1290_v12 = vadd.f32 %v1289_v52, %v1282_v35  ;;  %v1228_v15 = vrot.slane %v1227_v36, 2  ;;  %v1234_v0 = vrot.slane %v1233_v40, 2 }
 0x170   : > { %v1309_v22 = vadd.f32 %v1308_v9, %v1307_v27  ;;  %v1315_v18 = vadd.f32 %v1314_v20, %v1313_v2  ;;  %v1169_v19 = vadd.f32 %v1162_v58, %v2525_v4  ;;  %v1136_v46 = vadd.f32 %v1135_v62, %v1134_v6 }
 0x171   : > { %v1285_v47 = vrot.slane %v1284_v24, 2  ;;  %v1291_v59 = vrot.slane %v1290_v12, 2  ;;  %v1191_v7 = vadd.f32 %v1190_v30, %v1189_v5  ;;  %v1229_v45 = vadd.f32 %v1228_v15, %v1227_v36 }
 0x172   : > { %v1310_v43 = vrot.slane %v1309_v22, 1  ;;  %v1316_v51 = vrot.slane %v1315_v18, 1  ;;  %v1114_v37 = vadd.f32 %v2516_v39, %v2489_v55  ;;  %v1327_v21 = vmul.f32 %v1326_v44, %v2534_v32 }
 0x173   : > { %v1286_v53 = vadd.f32 %v1285_v47, %v1284_v24  ;;  %v1292_v29 = vadd.f32 %v1291_v59, %v1290_v12  ;;  %v1192_v23 = vadd.f32 %v1185_v60, %v1091_v34  ;;  %v1265_v10 = vadd.f32 %v1264_v8, %v1263_v3 }
 0x174   : > { %v1271_v28 = vadd.f32 %v1270_v14, %v1269_v31  ;;  %v1235_v50 = vadd.f32 %v1234_v0, %v1233_v40  ;;  %v1328_v58 = vmul.f32 %v1326_v44, %v2539_v48  ;;  %v1329_v62 = vrot.slane %v1327_v21, 4 }
 0x175   : > { %v1287_v4 = vrot.slane %v1286_v53, 1  ;;  %v1293_v6 = vrot.slane %v1292_v29, 1  ;;  %v1193_v5 = vadd.f32 %v1191_v7, %v2552_v16  ;;  %v1311_v30 = vadd.f32 %v1310_v43, %v1309_v22  ;;  %v2811_v7 = vld [vmem:[#allocation6_spill] sm:$0xff] }
 0x176   : > { %v1317_v33 = vadd.f32 %v1316_v51, %v1315_v18  ;;  %v1230_v35 = vrot.slane %v1229_v45, 1  ;;  %v1330_v39 = vadd.f32 %v1329_v62, %v1327_v21  ;;  %v1335_v2 = vrot.slane %v1328_v58, 4  ;;  %v2813_v21 = vld [vmem:[#allocation8_spill] sm:$0xff]  ;;  %v1824_v62 = vld [vmem:[%s2777_s5 + $0x8] ss:$0 sm:$0xff] }
 0x177   : > { %v1288_v27 = vadd.f32 %v1287_v4, %v1286_v53  ;;  %v1294_v55 = vadd.f32 %v1293_v6, %v1292_v29  ;;  %v1272_v63 = vadd.f32 %v1265_v10, %v1169_v19  ;;  %v1273_v32 = vadd.f32 %v1271_v28, %v2555_v13  ;;  %v2812_v53 = vld [vmem:[#allocation7_spill] sm:$0xff]  ;;  %v2814_v10 = vld [vmem:[#allocation9_spill] sm:$0xff] }
 0x178   : > { %v1215_v34 = vadd.f32 %v2557_v1, %v1114_v37  ;;  %v1236_v3 = vrot.slane %v1235_v50, 1  ;;  %v1331_v31 = vrot.slane %v1330_v39, 2  ;;  %v1336_v48 = vadd.f32 %v1335_v2, %v1328_v58 }
 0x179   : > { %v1295_v42 = vadd.f32 %v1288_v27, %v1192_v23  ;;  %v1296_v60 = vadd.f32 %v1294_v55, %v1193_v5  ;;  %v1319_v16 = vadd.f32 %v1317_v33, %v2542_v49  ;;  %v1231_v52 = vadd.f32 %v1230_v35, %v1229_v45 }
 0x17a   : > { %v1318_v17 = vadd.f32 %v1311_v30, %v1215_v34  ;;  %v1332_v36 = vadd.f32 %v1331_v31, %v1330_v39  ;;  %v1337_v40 = vrot.slane %v1336_v48, 2  ;;  %v1971_v8 = vmov 0  }
 0x17b   : > { %v1344_v9 = vsel %vm1343_vm14, %v1272_v63, %v1295_v42  ;;  %v1345_v20 = vsel %vm1343_vm14, %v1273_v32, %v1296_v60  ;;  %1885 = vset.pattern.permute.xlu1 %v1971_v8  ;;  %1886 = vset.pattern.permute.xlu0 %v1971_v8  ;;  %v1035_v13 = vadd.f32 %v2544_v61, %v2461_v11  ;;  %v1532_v11 = vsub.s32 5, %v2811_v7 }
 0x17c   : > { %v1347_v1 = vsel %vm1346_vm15, %v1344_v9, %v1318_v17  ;;  %v1348_v14 = vsel %vm1346_vm15, %v1345_v20, %v1319_v16  ;;  %v1137_v49 = vadd.f32 %v2559_v57, %v2548_v25  ;;  %v1237_v24 = vadd.f32 %v1236_v3, %v1235_v50 }
 0x17d   : > { %v1333_v12 = vrot.slane %v1332_v36, 1  ;;  %v1338_v22 = vadd.f32 %v1337_v40, %v1336_v48  ;;  %v1138_v18 = vadd.f32 %v1136_v46, %v1035_v13  ;;  %v1533_v25 = vrot.slane %v2498_v26, %v1532_v11 }
 0x17e   : > { %v1238_v15 = vadd.f32 %v1231_v52, %v1137_v49  ;;  %v1600_v46 = vsub.s32 7, %v2811_v7  ;;  %v1369_v29 = vrot.slane %v2498_v26, %v2812_v53  ;;  %v1403_v23 = vrot.slane %v2498_v26, %v2813_v21 }
 0x17f   : > { %v1334_v0 = vadd.f32 %v1333_v12, %v1332_v36  ;;  %v1339_v44 = vrot.slane %v1338_v22, 1  ;;  %v1239_v19 = vadd.f32 %v1237_v24, %v1138_v18  ;;  %v1473_v28 = vrot.slane %v2498_v26, %v2814_v10 }
 0x180   : > { %v1601_v37 = vrot.slane %v2498_v26, %v1600_v46  ;;  %v1497_v50 = vsub.s32 4, %v2811_v7  ;;  %v1567_v6 = vsub.s32 6, %v2811_v7 }
 0x181   : > { %v1340_v47 = vadd.f32 %v1339_v44, %v1338_v22  ;;  %v1341_v59 = vadd.f32 %v1334_v0, %v1238_v15 }
 0x182   : > { %v1498_v4 = vrot.slane %v2498_v26, %v1497_v50  ;;  %v1568_v58 = vrot.slane %v2498_v26, %v1567_v6  ;;  %v1677_v26 = vpop.permute.xlu0 %1676 }
 0x183   : > { %v1342_v61 = vadd.f32 %v1340_v47, %v1239_v19  ;;  %v1350_v43 = vsel %vm1349_vm6, %v1347_v1, %v1341_v59 }
 0x184   : > { %v2585_v51 = vmax.f32 %v1350_v43, 0.0 }
 0x185   : > { %v1351_v45 = vsel %vm1349_vm6, %v1348_v14, %v1342_v61 }
 0x186   : > { %1520 = vrot.lane.b32.xlu1 %v2585_v51, %s1967_s27  ;;  %1356 = vrot.lane.b32.xlu0 %v2585_v51, %s1963_s23  ;;  %v2592_v57 = vmax.f32 %v1351_v45, 0.0 }
 0x18a   : > { %1535 = vbcast.lane.b32.xlu1 %v1533_v25, 256  ;;  %1358 = vrot.lane.b32.xlu0 %v2592_v57, %s1963_s23 }
 0x18e   : > { %1557 = vrot.lane.b32.xlu1 %v2592_v57, %s1968_s14  ;;  %1392 = vrot.lane.b32.xlu0 %v2585_v51, %s1964_s26 }
 0x192   : > { %1590 = vrot.lane.b32.xlu1 %v2585_v51, %s1969_s28  ;;  %1394 = vrot.lane.b32.xlu0 %v2592_v57, %s1964_s26 }
 0x196   : > { %1603 = vbcast.lane.b32.xlu1 %v1601_v37, 256  ;;  %1371 = vbcast.lane.b32.xlu0 %v1369_v29, 256 }
 0x19a   : > { %1625 = vrot.lane.b32.xlu1 %v2592_v57, %s1970_s13  ;;  %1405 = vbcast.lane.b32.xlu0 %v1403_v23, 256 }
 0x19e   : > { %1425 = vrot.lane.b32.xlu0 %v2585_v51, %s1965_s11 }
 0x1a2   : > { %1427 = vrot.lane.b32.xlu0 %v2592_v57, %s1965_s11 }
 0x1a6   : > { %1460 = vrot.lane.b32.xlu0 %v2585_v51, %s1966_s20 }
 0x1aa   : > { %1462 = vrot.lane.b32.xlu0 %v2592_v57, %s1966_s20 }
 0x1ae   : > { %1475 = vbcast.lane.b32.xlu0 %v1473_v28, 256 }
 0x1b2   : > { %1500 = vbcast.lane.b32.xlu0 %v1498_v4, 256 }
 0x1b6   : > { %1522 = vrot.lane.b32.xlu0 %v2592_v57, %s1967_s27  ;;  %s319_s27 = scalar_lea.vmem %s2772_s0, %s1833_s19  ;;  %s312_s19 = sand.u32 1, %s1953_s30  }
 0x1b7   : > { %s1729_s23 = scalar_lea.sflag [#allocation4], %s312_s19 }
 0x1ba   : > { %1555 = vrot.lane.b32.xlu0 %v2585_v51, %s1968_s14  ;;  %s1818_s14 = sshll.u32 %s312_s19, 1 }
 0x1be   : > { %1570 = vbcast.lane.b32.xlu0 %v1568_v58, 256 }
 0x1c2   : > { %1592 = vrot.lane.b32.xlu0 %v2592_v57, %s1969_s28  ;;  %s1835_s28 = sshll.u32 %s2043_s7, 5  ;;  %s1973_s7 = smov [#allocation3]  }
 0x1c3   : > { %s2730_s22 = scalar_lea.hbm %s2780_s8, %s1835_s28  ;;  %s1903_s11 = sshll.u32 %s1973_s7, 4  ;;  %s1904_s11 = int_to_ptr.vmem [resolvable:$false] %s1903_s11 }
 0x1c4   : > { %s1905_s20 = scalar_lea.vmem %s1904_s11, 64 }
 0x1c6   : > { %1623 = vrot.lane.b32.xlu0 %v2585_v51, %s1970_s13  ;;  %s314_s13 = scalar_lea.vmem [#allocation3], %s1818_s14 }
 0x1c7   : > { %s1743_s24 = sshll.u32 %s314_s13, 4  ;;  %s2732_s24 = int_to_ptr.vmem [resolvable:$true] %s1743_s24 }
 0x1c8   : > { %s1899_s26 = scalar_lea.vmem %s2732_s24, 32  ;;  %p1906_p0 = scmp.lt.s32.totalorder %s2732_s24, %s1904_s11 }
 0x1c9   : > { %p1900_p11 = scmp.ne.s32.totalorder %s2732_s24, %s1899_s26  ;;  %p1907_p1 = scmp.lt.s32.totalorder %s1905_s20, %s1899_s26 }
 0x1ca   : > { %1638 = vbcast.lane.b32.xlu0 %v1824_v62, 256 }
 0x1cb   : > { %p1901_p12 = pnand %p1900_p11, %p2060_p5  ;;  %p1908_p2 = por %p1907_p1, %p1906_p0 }
 0x1cd   : > { %p1902_p13 = pneg %p1901_p12 }
 0x1cf   : > { %p1909_p3 = pnand %p1908_p2, %p1902_p13 }
 0x1d8   : > { %v414_v5 = vpop.xlane.xlu1 %413 }
 0x1d9   : > { %v1823_v30 = vmul.f32 -1.442695, %v414_v5 }
 0x1db   : > { %1887 = vpow2.f32 %v1823_v30 }
 0x1dc   : > { %v1441_v3 = vpop.permute.xlu1 %1440 }
 0x1e5   : > { %v1888_v33 = vpop.eup %1887 }
 0x1e6   : > { %v418_v35 = vadd.f32 1.0, %v1888_v33 }
 0x1e8   : > { %1889 = vrcp.f32 %v418_v35 }
 0x1f2   : > { %v1890_v27 = vpop.eup %1889 }
 0x1f3   : > { %v1679_v55 = vmul.f32 %v1890_v27, %v1677_v26 }
 0x1f5   : > { %1682 = vperm.xlu1 %1885, %v1679_v55  }
 0x1f8   : > { %v1357_v39 = vpop.permute.xlu0 %1356  ;;  %v1521_v60 = vpop.permute.xlu1 %1520 }
 0x1f9   : > { %v1363_v16 = vsel %vm427_vm0, 0.0, %v1357_v39 }
 0x1fa   : > { %v1364_v20 = vsel %vm2205_vm1, %v1363_v16, 0.0 }
 0x1fc   : > { %v1359_v2 = vpop.permute.xlu0 %1358  ;;  %v2637_v17 = vpop.permute.xlu1 %1535 }
 0x1fd   : > { %v1360_v9 = vsel %vm427_vm0, %v1357_v39, %v1359_v2 }
 0x1fe   : > { %v1365_v13 = vsel %vm2212_vm2, %v1360_v9, 0.0 }
 0x200   : > { %v1393_v63 = vpop.permute.xlu0 %1392  ;;  %v1558_v36 = vpop.permute.xlu1 %1557 }
 0x201   : > { %v1399_v15 = vsel %vm534_vm5, 0.0, %v1393_v63  ;;  %v1562_v58 = vsel %vm1040_vm11, %v1558_v36, 0.0 }
 0x204   : > { %v1395_v32 = vpop.permute.xlu0 %1394  ;;  %v2646_v24 = vpop.permute.xlu1 %1590 }
 0x205   : > { %v1396_v44 = vsel %vm534_vm5, %v1393_v63, %v1395_v32 }
 0x208   : > { %v1372_v34 = vpop.permute.xlu0 %1371  ;;  %v2651_v59 = vpop.permute.xlu1 %1603 }
 0x209   : > { %v1373_v40 = vmul.f32 %v1372_v34, %v1364_v20  ;;  %v1374_v1 = vmul.f32 %v1372_v34, %v1365_v13 }
 0x20b   : > { %v1376_v14 = vsel %vm1375_vm12, %v1373_v40, 0.0  ;;  %v1383_v22 = vsel %vm1375_vm12, %v1374_v1, 0.0 }
 0x20c   : > { %v1406_v42 = vpop.permute.xlu0 %1405  ;;  %v1377_v12 = vrot.slane %v1376_v14, 4  ;;  %v1384_v0 = vrot.slane %v1383_v22, 4  ;;  %v1626_v23 = vpop.permute.xlu1 %1625 }
 0x20d   : > { %v1407_v47 = vmul.f32 %v1406_v42, %v1399_v15  ;;  %v1408_v11 = vmul.f32 %v1406_v42, %v1396_v44  ;;  %v1630_v30 = vsel %vm1244_vm13, %v1626_v23, 0.0 }
 0x20e   : > { %v1378_v19 = vadd.f32 %v1377_v12, %v1376_v14  ;;  %v1385_v43 = vadd.f32 %v1384_v0, %v1383_v22  ;;  %v1632_v16 = vsel %vm2278_vm7, %v1630_v30, 0.0 }
 0x20f   : > { %v1409_v25 = vsel %vm1375_vm12, %v1407_v47, 0.0  ;;  %v1416_v53 = vsel %vm1375_vm12, %v1408_v11, 0.0 }
 0x210   : > { %v1426_v31 = vpop.permute.xlu0 %1425  ;;  %v1379_v45 = vrot.slane %v1378_v19, 2  ;;  %v1386_v21 = vrot.slane %v1385_v43, 2  ;;  %v1410_v10 = vrot.slane %v1409_v25, 4  ;;  %v1417_v6 = vrot.slane %v1416_v53, 4 }
 0x211   : > { %v1432_v46 = vsel %vm635_vm3, 0.0, %v1426_v31 }
 0x212   : > { %v1433_v28 = vsel %vm2237_vm4, %v1432_v46, 0.0  ;;  %v1380_v4 = vadd.f32 %v1379_v45, %v1378_v19  ;;  %v1387_v26 = vadd.f32 %v1386_v21, %v1385_v43  ;;  %v1411_v55 = vadd.f32 %v1410_v10, %v1409_v25 }
 0x213   : > { %v1442_v33 = vmul.f32 %v1441_v3, %v1433_v28  ;;  %v2666_v63 = vadd.f32 %v1417_v6, %v1416_v53 }
 0x214   : > { %v1428_v48 = vpop.permute.xlu0 %1427  ;;  %v1381_v2 = vrot.slane %v1380_v4, 1  ;;  %v1388_v40 = vrot.slane %v1387_v26, 1  ;;  %v1412_v14 = vrot.slane %v1411_v55, 2 }
 0x215   : > { %v1429_v37 = vsel %vm635_vm3, %v1426_v31, %v1428_v48  ;;  %v1419_v12 = vrot.slane %v2666_v63, 2 }
 0x216   : > { %v1434_v50 = vsel %vm2278_vm7, %v1429_v37, 0.0  ;;  %v2685_v1 = vadd.f32 %v1381_v2, %v1380_v4  ;;  %v2700_v43 = vadd.f32 %v1388_v40, %v1387_v26 }
 0x217   : > { %v1443_v35 = vmul.f32 %v1441_v3, %v1434_v50  ;;  %v1564_v3 = vsel %vm2212_vm2, %v1562_v58, 0.0 }
 0x218   : > { %v1461_v52 = vpop.permute.xlu0 %1460 }
 0x219   : > { %v1467_v62 = vsel %vm742_vm8, 0.0, %v1461_v52 }
 0x21a   : > { %v1468_v32 = vsel %vm2205_vm1, %v1467_v62, 0.0 }
 0x21c   : > { %v1463_v8 = vpop.permute.xlu0 %1462 }
 0x21d   : > { %v1464_v27 = vsel %vm742_vm8, %v1461_v52, %v1463_v8  ;;  %v1451_v52 = vsel %vm1375_vm12, %v1443_v35, 0.0 }
 0x21e   : > { %v1469_v42 = vsel %vm2212_vm2, %v1464_v27, 0.0 }
 0x220   : > { %v1476_v49 = vpop.permute.xlu0 %1475 }
 0x221   : > { %v1477_v31 = vmul.f32 %v1476_v49, %v1468_v32  ;;  %v1478_v9 = vmul.f32 %v1476_v49, %v1469_v42  ;;  %v1452_v49 = vrot.slane %v1451_v52, 4 }
 0x223   : > { %v1479_v0 = vsel %vm1375_vm12, %v1477_v31, 0.0  ;;  %v1453_v28 = vadd.f32 %v1452_v49, %v1451_v52 }
 0x224   : > { %v1501_v18 = vpop.permute.xlu0 %1500  ;;  %v1480_v45 = vrot.slane %v1479_v0, 4 }
 0x225   : > { %v1502_v8 = vmul.f32 %v1501_v18, %v2585_v51  ;;  %v1503_v22 = vmul.f32 %v1501_v18, %v2592_v57  ;;  %v1486_v51 = vsel %vm1375_vm12, %v1478_v9, 0.0  ;;  %v1454_v32 = vrot.slane %v1453_v28, 2 }
 0x226   : > { %v1487_v37 = vrot.slane %v1486_v51, 4  ;;  %v1481_v58 = vadd.f32 %v1480_v45, %v1479_v0 }
 0x227   : > { %v1504_v11 = vsel %vm1375_vm12, %v1502_v8, 0.0  ;;  %v1511_v25 = vsel %vm1375_vm12, %v1503_v22, 0.0 }
 0x228   : > { %v1523_v61 = vpop.permute.xlu0 %1522  ;;  %v1512_v50 = vrot.slane %v1511_v25, 4  ;;  %v1488_v35 = vadd.f32 %v1487_v37, %v1486_v51 }
 0x229   : > { %v1524_v39 = vsel %vm937_vm9, %v1521_v60, %v1523_v61  ;;  %v1527_v34 = vsel %vm937_vm9, %v1523_v61, 0.0  ;;  %v1444_v60 = vsel %vm1375_vm12, %v1442_v33, 0.0  ;;  %v1413_v33 = vadd.f32 %v1412_v14, %v1411_v55 }
 0x22a   : > { %v1528_v20 = vsel %vm2237_vm4, %v1524_v39, 0.0  ;;  %v1529_v13 = vsel %vm2278_vm7, %v1527_v34, 0.0  ;;  %v1445_v15 = vrot.slane %v1444_v60, 4  ;;  %v1513_v34 = vadd.f32 %v1512_v50, %v1511_v25 }
 0x22b   : > { %v1537_v44 = vmul.f32 %v2637_v17, %v1528_v20  ;;  %v1538_v38 = vmul.f32 %v2637_v17, %v1529_v13  ;;  %v1420_v55 = vadd.f32 %v1419_v12, %v2666_v63  ;;  %v1489_v52 = vrot.slane %v1488_v35, 2 }
 0x22c   : > { %v1556_v29 = vpop.permute.xlu0 %1555  ;;  %v1446_v17 = vadd.f32 %v1445_v15, %v1444_v60  ;;  %v1455_v14 = vadd.f32 %v1454_v32, %v1453_v28  ;;  %v1514_v22 = vrot.slane %v1513_v34, 2  ;;  %v1414_v0 = vrot.slane %v1413_v33, 1 }
 0x22d   : > { %v1559_v56 = vsel %vm1040_vm11, %v1556_v29, %v1558_v36  ;;  %v1539_v54 = vsel %vm1375_vm12, %v1537_v44, 0.0  ;;  %v1505_v29 = vrot.slane %v1504_v11, 4  ;;  %v1546_v21 = vsel %vm1375_vm12, %v1538_v38, 0.0 }
 0x22e   : > { %v1563_v36 = vsel %vm2205_vm1, %v1559_v56, 0.0  ;;  %v1540_v62 = vrot.slane %v1539_v54, 4  ;;  %v1547_v27 = vrot.slane %v1546_v21, 4  ;;  %v1447_v39 = vrot.slane %v1446_v17, 2 }
 0x22f   : > { %v1421_v38 = vrot.slane %v1420_v55, 1  ;;  %v1515_v45 = vadd.f32 %v1514_v22, %v1513_v34 }
 0x230   : > { %v1571_v5 = vpop.permute.xlu0 %1570  ;;  %v1548_v9 = vadd.f32 %v1547_v27, %v1546_v21  ;;  %v1448_v40 = vadd.f32 %v1447_v39, %v1446_v17  ;;  %v1415_v17 = vadd.f32 %v1414_v0, %v1413_v33 }
 0x231   : > { %v1572_v57 = vmul.f32 %v1571_v5, %v1563_v36  ;;  %v1573_v46 = vmul.f32 %v1571_v5, %v1564_v3  ;;  %v1482_v3 = vrot.slane %v1481_v58, 2  ;;  %v1490_v36 = vadd.f32 %v1489_v52, %v1488_v35 }
 0x232   : > { %v1449_v63 = vrot.slane %v1448_v40, 1 }
 0x233   : > { %v1574_v4 = vsel %vm1375_vm12, %v1572_v57, 0.0  ;;  %v1581_v5 = vsel %vm1375_vm12, %v1573_v46, 0.0  ;;  %v1483_v44 = vadd.f32 %v1482_v3, %v1481_v58  ;;  %v1516_v58 = vrot.slane %v1515_v45, 1 }
 0x234   : > { %v1593_v48 = vpop.permute.xlu0 %1592  ;;  %v1575_v2 = vrot.slane %v1574_v4, 4  ;;  %v1582_v42 = vrot.slane %v1581_v5, 4 }
 0x235   : > { %v1594_v47 = vsel %vm1143_vm10, %v2646_v24, %v1593_v48  ;;  %v1597_v18 = vsel %vm1143_vm10, %v1593_v48, 0.0  ;;  %v1541_v48 = vadd.f32 %v1540_v62, %v1539_v54  ;;  %v1484_v37 = vrot.slane %v1483_v44, 1 }
 0x236   : > { %v1605_v53 = vmul.f32 %v2651_v59, %v1594_v47  ;;  %v1606_v10 = vmul.f32 %v2651_v59, %v1597_v18  ;;  %v1506_v59 = vadd.f32 %v1505_v29, %v1504_v11  ;;  %v1576_v13 = vadd.f32 %v1575_v2, %v1574_v4 }
 0x237   : > { %v1583_v15 = vadd.f32 %v1582_v42, %v1581_v5  ;;  %v1549_v47 = vrot.slane %v1548_v9, 2  ;;  %v1491_v29 = vrot.slane %v1490_v36, 1  ;;  %v1485_v35 = vadd.f32 %v1484_v37, %v1483_v44 }
 0x238   : > { %v1624_v19 = vpop.permute.xlu0 %1623  ;;  %v1607_v26 = vsel %vm1375_vm12, %v1605_v53, 0.0  ;;  %v1614_v41 = vsel %vm1375_vm12, %v1606_v10, 0.0  ;;  %v1507_v8 = vrot.slane %v1506_v59, 2  ;;  %v1577_v57 = vrot.slane %v1576_v13, 2 }
 0x239   : > { %v1627_v61 = vsel %vm1244_vm13, %v1624_v19, %v1626_v23  ;;  %v1608_v60 = vrot.slane %v1607_v26, 4  ;;  %v1615_v20 = vrot.slane %v1614_v41, 4  ;;  %v1542_v19 = vrot.slane %v1541_v48, 2 }
 0x23a   : > { %v1631_v23 = vsel %vm2237_vm4, %v1627_v61, 0.0  ;;  %v1508_v12 = vadd.f32 %v1507_v8, %v1506_v59  ;;  %v1456_v61 = vrot.slane %v1455_v14, 1  ;;  %v1584_v25 = vrot.slane %v1583_v15, 2 }
 0x23b   : > { %v1609_v51 = vadd.f32 %v1608_v60, %v1607_v26  ;;  %v1616_v11 = vadd.f32 %v1615_v20, %v1614_v41  ;;  %v1543_v54 = vadd.f32 %v1542_v19, %v1541_v48  ;;  %v1550_v21 = vadd.f32 %v1549_v47, %v1548_v9 }
 0x23c   : > { %v1639_v24 = vpop.permute.xlu0 %1638  ;;  %v1509_v28 = vrot.slane %v1508_v12, 1  ;;  %v1578_v50 = vadd.f32 %v1577_v57, %v1576_v13  ;;  %v1585_v62 = vadd.f32 %v1584_v25, %v1583_v15  ;;  %v1492_v39 = vadd.f32 %v1491_v29, %v1490_v36  ;;  %v326_v25 = vld [vmem:[%s319_s27 + $0x8] sm:$0xff] }
 0x23d   : > { %v1640_v6 = vmul.f32 %v1639_v24, %v1631_v23  ;;  %v1641_v30 = vmul.f32 %v1639_v24, %v1632_v16  ;;  %v1610_v53 = vrot.slane %v1609_v51, 2  ;;  %v1422_v24 = vadd.f32 %v1421_v38, %v1420_v55 }
 0x23e   : > { %v1617_v10 = vrot.slane %v1616_v11, 2  ;;  %v1450_v23 = vadd.f32 %v1449_v63, %v1448_v40  ;;  %v1544_v27 = vrot.slane %v1543_v54, 1  ;;  %v1551_v59 = vrot.slane %v1550_v21, 1 }
 0x23f   : > { %v1642_v31 = vsel %vm1375_vm12, %v1640_v6, 0.0  ;;  %v1649_v16 = vsel %vm1375_vm12, %v1641_v30, 0.0  ;;  %v1457_v6 = vadd.f32 %v1456_v61, %v1455_v14  ;;  %v1423_v30 = vadd.f32 %v1415_v17, %v2685_v1 }
 0x240   : > { %v1643_v56 = vrot.slane %v1642_v31, 4  ;;  %v1650_v49 = vrot.slane %v1649_v16, 4  ;;  %v1611_v33 = vadd.f32 %v1610_v53, %v1609_v51  ;;  %v1424_v26 = vadd.f32 %v1422_v24, %v2700_v43 }
 0x241   : > { %v1618_v2 = vadd.f32 %v1617_v10, %v1616_v11  ;;  %v1458_v41 = vadd.f32 %v1450_v23, %v1423_v30  ;;  %v1510_v32 = vadd.f32 %v1509_v28, %v1508_v12  ;;  %v1579_v34 = vrot.slane %v1578_v50, 1 }
 0x242   : > { %v1644_v18 = vadd.f32 %v1643_v56, %v1642_v31  ;;  %v1651_v46 = vadd.f32 %v1650_v49, %v1649_v16  ;;  %v1459_v31 = vadd.f32 %v1457_v6, %v1424_v26  ;;  %v1517_v3 = vadd.f32 %v1516_v58, %v1515_v45  ;;  %v325_v45 = vld [vmem:[%s319_s27] sm:$0xff] }
 0x243   : > { %v1586_v48 = vrot.slane %v1585_v62, 1  ;;  %v1493_v16 = vadd.f32 %v1485_v35, %v1458_v41  ;;  %v1545_v55 = vadd.f32 %v1544_v27, %v1543_v54  ;;  %v1612_v52 = vrot.slane %v1611_v33, 1 }
 0x244   : > { %v1645_v4 = vrot.slane %v1644_v18, 2  ;;  %v1652_v5 = vrot.slane %v1651_v46, 2  ;;  %v1494_v1 = vadd.f32 %v1492_v39, %v1459_v31  ;;  %v1552_v9 = vadd.f32 %v1551_v59, %v1550_v21 }
 0x245   : > { %v1619_v20 = vrot.slane %v1618_v2, 1  ;;  %v1518_v40 = vadd.f32 %v1510_v32, %v1493_v16  ;;  %v1580_v8 = vadd.f32 %v1579_v34, %v1578_v50  ;;  %v1587_v56 = vadd.f32 %v1586_v48, %v1585_v62 }
 0x246   : > { %v1646_v42 = vadd.f32 %v1645_v4, %v1644_v18  ;;  %v1653_v60 = vadd.f32 %v1652_v5, %v1651_v46  ;;  %v1519_v13 = vadd.f32 %v1517_v3, %v1494_v1  ;;  %v1613_v15 = vadd.f32 %v1612_v52, %v1611_v33 }
 0x247   : > { %v1553_v22 = vadd.f32 %v1545_v55, %v1518_v40  ;;  %v1620_v0 = vadd.f32 %v1619_v20, %v1618_v2  ;;  %v1972_v6 = vmov 1966171168   ;;  %v1702_v39 = vstv %s1701_s18 }
 0x248   : > { %v1647_v43 = vrot.slane %v1646_v42, 1  ;;  %v1654_v14 = vrot.slane %v1653_v60, 1  ;;  %v1554_v49 = vadd.f32 %v1552_v9, %v1519_v13  ;;  %v1709_v58 = vunpack.c.l.s4 %v1972_v6 }
 0x249   : > { %v1588_v44 = vadd.f32 %v1580_v8, %v1553_v22  ;;  %v2815_v3 = vlaneseq }
 0x24a   : > { %v1648_v19 = vadd.f32 %v1647_v43, %v1646_v42  ;;  %v1589_v51 = vadd.f32 %v1587_v56, %v1554_v49  ;;  %v1655_v38 = vadd.f32 %v1654_v14, %v1653_v60  ;;  %v1710_v33 = vunpack.c.0.s8 %v1709_v58 }
 0x24b   : > { %v1621_v36 = vadd.f32 %v1613_v15, %v1588_v44  ;;  %vm1725_vm0 = vcmp.lt.s32.totalorder %v2815_v3, 256 }
 0x24c   : > { %v1622_v47 = vadd.f32 %v1620_v0, %v1589_v51  ;;  %v1713_v34 = vsub.s32 %v1710_v33, %v2811_v7 }
 0x24d   : > { %v1656_v11 = vadd.f32 %v1648_v19, %v1621_v36 }
 0x24e   : > { %v1657_v63 = vadd.f32 %v1655_v38, %v1622_v47 }
 0x24f   : > { %v1825_v12 = vmul.f32 -1.442695, %v1656_v11 }
 0x250   : > { %v1826_v57 = vmul.f32 -1.442695, %v1657_v63 }
 0x251   : > { %1891 = vpow2.f32 %v1825_v12 }
 0x252   : > { %1893 = vpow2.f32 %v1826_v57 }
 0x25b   : > { %v1892_v18 = vpop.eup %1891 }
 0x25c   : > { %v1894_v61 = vpop.eup %1893  ;;  %v1664_v46 = vadd.f32 1.0, %v1892_v18 }
 0x25d   : > { %v1665_v17 = vadd.f32 1.0, %v1894_v61 }
 0x25e   : > { %1895 = vrcp.f32 %v1664_v46 }
 0x25f   : > { %1897 = vrcp.f32 %v1665_v17 }
 0x268   : > { %v1896_v30 = vpop.eup %1895 }
 0x269   : > { %v1898_v26 = vpop.eup %1897 }
 0x274   : > { %v1683_v37 = vpop.permute.xlu1 %1682 }
 0x275   : > { %v1685_v54 = vmul.f32 %v1683_v37, %v325_v45  ;;  %v1686_v53 = vmul.f32 %v1683_v37, %v326_v25 }
 0x277   : > { %v1687_v24 = vrot.slane %v1685_v54, 4  ;;  %v1693_v29 = vrot.slane %v1686_v53, 4 }
 0x279   : > { %v1688_v21 = vadd.f32 %v1687_v24, %v1685_v54  ;;  %v1694_v10 = vadd.f32 %v1693_v29, %v1686_v53 }
 0x27b   : > { %v1689_v23 = vrot.slane %v1688_v21, 2  ;;  %v1695_v28 = vrot.slane %v1694_v10, 2 }
 0x27d   : > { %v1690_v50 = vadd.f32 %v1689_v23, %v1688_v21  ;;  %v1696_v4 = vadd.f32 %v1695_v28, %v1694_v10 }
 0x27f   : > { %v1691_v62 = vrot.slane %v1690_v50, 1  ;;  %v1697_v5 = vrot.slane %v1696_v4, 1 }
 0x281   : > { %v1692_v35 = vadd.f32 %v1691_v62, %v1690_v50  ;;  %v1698_v27 = vadd.f32 %v1697_v5, %v1696_v4 }
 0x283   : > { %v1699_v59 = vmul.f32 %v1896_v30, %v1692_v35  ;;  %v1700_v2 = vmul.f32 %v1898_v26, %v1698_v27 }
 0x285   : > { %v1703_v41 = vadd.f32 %v1702_v39, %v1699_v59  ;;  %v1704_v32 = vadd.f32 %v1702_v39, %v1700_v2 }
 0x287   : > { %v1707_v42 = vcombine.low %v1703_v41, %v1704_v32 }
 0x289   : > { %v1714_v31 = vrot.slane %v1707_v42, %v1713_v34 }
 0x28b   : > { %v1721_v48 = vrot.slane %v1714_v31, %v1713_v34 }
 0x28d   : > { %1727 = vst.msk [vmem:[%s314_s13] sm:$0x3] %vm1725_vm0, %v1721_v48 }
 0x28e   : > { %1912 = shalt.err (!%p1909_p3)
}
 0x28f   : > { %s1913_s27 = scalar_lea.hbm %s2730_s22, 32  ;;  %s1917_s14 = scalar_lea.hbm %s2780_s8, 64 }
 0x290   : > { %p1914_p4 = scmp.ne.s32.totalorder %s2730_s22, %s1913_s27  ;;  %p1918_p9 = scmp.lt.u32.totalorder %s2730_s22, %s2780_s8 }
 0x291   : > { %p1919_p10 = scmp.lt.u32.totalorder %s1917_s14, %s1913_s27  ;;  %p1921_p12 = scmp.lt.u32.totalorder %s1913_s27, %s2730_s22 }
 0x292   : > { %p1915_p7 = pnand %p1914_p4, %p2060_p5 }
 0x293   : > { %p1920_p11 = por %p1919_p10, %p1918_p9 }
 0x294   : > { %p1916_p8 = pneg %p1915_p7 }
 0x295   : > { %p1922_p13 = por %p1921_p12, %p1920_p11 }
 0x297   : > { %p1923_p0 = pnand %p1922_p13, %p1916_p8 }
 0x299   : > { %1926 = shalt.err (!%p1923_p0)
}
 0x29a   : > { %1836 = dma.vmem_to_hbm [thread:$0]  (%p2060_p5), %s2732_s24, 32, %s2730_s22, %s1729_s23  }
 0x29b PF: > { %p1842_p1 = scmp.ge.s32.totalorder %s1961_s10, 2  ;;  %s1755_s25 = sand.u32 1, %s1949_s29  }
 0x29c   : > { %s1756_s21 = scalar_lea.sflag [#allocation4], %s1755_s25 }
 0x29d   : > { %p1839_p2 = pnand %p1842_p1, %p2064_p6 }
 0x29f   : > { %1944 = dma.done.wait (!%p1839_p2), %s1756_s21, 32  }
 0x2a0   : > { %1946 = vsyncadd (!%p1839_p2), %s1756_s21, 4294967264  ;;  %p19_p3 = scmp.ge.s32.totalorder %s2047_s12, 4   ;;  %s2816_s29 = smov %s1953_s30 }
 0x2a1   : > { %s2817_s30 = smov %s1957_s9  ;;  %s2818_s9 = smov %s2058_s15 }
 0x2a2   : > { %s2819_s10 = smov %s2047_s12  ;;  %21 = sbr.rel (!%p19_p3) target bundleno = 5 (0x5), region = 90 }
 0x2a9   :  { %1761 = vsyncpa [#allocation4], 1 }
 0x2aa   :  { %1763 = vsyncpa [#allocation4 + $0x1], 1 }

</bundles_post_ra>
